<compile_context>
chip_gen: v7x
topology: tpu7x:2x2x1
jax: 0.10.0
libtpu: 0.0.40
codegen_flags: <defaults>
</compile_context>

<pallas_src>
import functools

import jax
import jax.numpy as jnp
from jax.experimental import pallas as pl
from jax.experimental.pallas import tpu as pltpu


def _round_up(x, m):
    return (x + m - 1) // m * m


def _cdiv(a, b):
    return (a + b - 1) // b


def ppo_critic_kernel(x_ref, w1_ref, b1_ref, w2_ref, b2_ref, w3_ref, b3_ref,
                      out_ref, *, precision, tanh_dtype):
    # x_ref : (TILE_B, D)          input dtype (f32; cast to MXU dtype here)
    # w1_ref: (D,   H1p)           compute dtype
    # b1_ref: (1,   H1p)           f32
    # w2_ref: (H1p, H2p)           compute dtype
    # b2_ref: (1,   H2p)           f32
    # w3_ref: (1,   H2p)           f32  (value-head weight as a lane row)
    # b3_ref: (1,)                 f32  (SMEM scalar)
    # out   : (1, TILE_B//128, 128) f32, lane-dense (batch along lanes)
    cdt = w1_ref.dtype
    x = x_ref[...].astype(cdt)                       # in-kernel cast (free on VPU)

    # Layers 1/2: MXU matmuls with f32 accumulation; bias add in f32, tanh in
    # `tanh_dtype` (bf16 on the bf16 path -> faster EUP on v6e/v7x).
    h = jnp.dot(x, w1_ref[...], preferred_element_type=jnp.float32,
                precision=precision)
    h = jnp.tanh((h + b1_ref[...]).astype(tanh_dtype)).astype(cdt)
    h = jnp.dot(h, w2_ref[...], preferred_element_type=jnp.float32,
                precision=precision)
    h = jnp.tanh((h + b2_ref[...]).astype(tanh_dtype))          # (TILE_B, H2p)

    # Value head (out_features = 1): VPU multiply + XLU lane reduction, then a
    # per-128-row-group transpose into lanes (identity mask + sublane reduce)
    # so each store is a dense 128-lane row instead of masked partial stores.
    w3 = w3_ref[...]                                             # (1, H2p) f32
    b3 = b3_ref[0]
    r = jax.lax.broadcasted_iota(jnp.int32, (128, 128), 0)
    c = jax.lax.broadcasted_iota(jnp.int32, (128, 128), 1)
    eye = (r == c).astype(jnp.float32)                           # (128, 128)

    num_groups = x_ref.shape[0] // 128                           # <= 32, static
    for g in range(num_groups):
        hg = h[g * 128:(g + 1) * 128, :].astype(jnp.float32)     # (128, H2p)
        vg = jnp.sum(hg * w3, axis=-1, keepdims=True)            # (128, 1)
        rowg = jnp.sum(vg * eye, axis=0, keepdims=True) + b3     # (1, 128)
        out_ref[0, pl.ds(g, 1), :] = rowg.astype(out_ref.dtype)


def prepare_params(params, compute_dtype=jnp.bfloat16):
    """Pad hidden dims to 128-lane multiples and cast ONCE (hoisted out of the
    per-minibatch hot path; PPO reuses params across many forward calls)."""
    w1, b1, w2, b2, w3, b3 = params
    D, H1 = w1.shape
    H2 = w2.shape[1]
    H1p, H2p = _round_up(H1, 128), _round_up(H2, 128)
    w1p = jnp.pad(w1, ((0, 0), (0, H1p - H1))).astype(compute_dtype)
    b1p = jnp.pad(jnp.reshape(b1, (1, H1)), ((0, 0), (0, H1p - H1))).astype(jnp.float32)
    w2p = jnp.pad(w2, ((0, H1p - H1), (0, H2p - H2))).astype(compute_dtype)
    b2p = jnp.pad(jnp.reshape(b2, (1, H2)), ((0, 0), (0, H2p - H2))).astype(jnp.float32)
    w3r = jnp.pad(w3, ((0, H2p - H2), (0, 0))).astype(jnp.float32).reshape(1, H2p)
    b3s = jnp.reshape(b3, (-1,)).astype(jnp.float32)[:1]
    return (w1p, b1p, w2p, b2p, w3r, b3s)


def _choose_batch_tiling(B, D, H1p, H2p, w_itemsize, *, max_tile=4096,
                         vmem_budget_bytes=20 * 1024 * 1024):
    """Pick (tile, num_tiles) so the per-step working set fits a conservative
    VMEM budget (portable to v7x's 64 MiB) and padding waste stays small."""
    weight_bytes = (D * H1p + H1p * H2p) * w_itemsize + (H1p + 2 * H2p + 8) * 4
    per_row = (2 * D * 4            # double-buffered f32 x tile
               + (H1p + H2p) * 4    # f32 layer intermediates
               + 2 * 4 + 64)        # double-buffered out row + slack
    budget = max(vmem_budget_bytes - weight_bytes, 512 * 1024)
    tile_cap = max(128, min(max_tile, budget // per_row // 128 * 128))
    num_tiles = _cdiv(B, tile_cap)
    tile = _round_up(_cdiv(B, num_tiles), 128)
    return tile, num_tiles


def ppo_critic_forward(x, prepared_params, *, tanh_dtype=None, max_tile=4096):
    """Fused PPO critic forward.  x: (B, D) -> value: (B, 1) f32."""
    w1p, b1p, w2p, b2p, w3r, b3s = prepared_params
    B, D = x.shape
    H1p, H2p = w1p.shape[1], w2p.shape[1]
    cdt = w1p.dtype
    if tanh_dtype is None:
        # bf16 tanh on the bf16-MXU path (v6e/v7x EUP is bf16-capable).
        # TODO(synk): force jnp.float32 here on v5e (no native bf16 VPU/EUP).
        tanh_dtype = cdt
    precision = (jax.lax.Precision.HIGHEST if cdt == jnp.float32
                 else jax.lax.Precision.DEFAULT)

    tile, num_tiles = _choose_batch_tiling(
        B, D, H1p, H2p, jnp.dtype(cdt).itemsize, max_tile=max_tile)
    B_pad = tile * num_tiles
    xp = x if B_pad == B else jnp.pad(x, ((0, B_pad - B), (0, 0)))

    def const_spec(a):
        # Fetched once (constant index_map); single-buffered to halve the
        # resident-weight VMEM footprint.
        return pl.BlockSpec(a.shape, lambda i, _n=a.ndim: (0,) * _n,
                            pipeline_mode=pl.Buffered(1))

    kernel = functools.partial(ppo_critic_kernel, precision=precision,
                               tanh_dtype=tanh_dtype)

    out = pl.pallas_call(
        kernel,
        out_shape=jax.ShapeDtypeStruct((num_tiles, tile // 128, 128), jnp.float32),
        grid=(num_tiles,),
        in_specs=[
            pl.BlockSpec((tile, D), lambda i: (i, 0)),            # x: batch-tiled
            const_spec(w1p), const_spec(b1p),                     # resident weights
            const_spec(w2p), const_spec(b2p),
            const_spec(w3r),
            pl.BlockSpec(memory_space=pltpu.MemorySpace.SMEM),    # b3 scalar
        ],
        out_specs=pl.BlockSpec((1, tile // 128, 128), lambda i: (i, 0, 0)),
        compiler_params=pltpu.CompilerParams(
            # TODO(synk): on v7x verify this shards tiles across both
            # TensorCores; if not, switch to pltpu.CORE_PARALLEL / core_map.
            dimension_semantics=("parallel",),
            vmem_limit_bytes=32 * 1024 * 1024,
        ),
    )(xp, w1p, b1p, w2p, b2p, w3r, b3s)

    # (num_tiles, tile//128, 128) row-major == batch order; slice off padding.
    return out.reshape(-1)[:B].reshape(B, 1)


def init_params(key, input_dim, hidden_dim):
    """Deterministic synthetic init (stand-in for MLP 'critic' init)."""
    dims = [input_dim] + list(hidden_dim) + [1]
    params = []
    for i in range(len(dims) - 1):
        key, kw = jax.random.split(key)
        fan_in, fan_out = dims[i], dims[i + 1]
        scale = jnp.sqrt(2.0 / fan_in)
        w = jax.random.normal(kw, (fan_in, fan_out), jnp.float32) * scale
        b = jnp.zeros((1, fan_out), jnp.float32)
        params.extend([w, b])
    return tuple(params)


def reference_forward(x, params):
    w1, b1, w2, b2, w3, b3 = params
    hp = jax.lax.Precision.HIGHEST
    h = jnp.tanh(jnp.dot(x, w1, precision=hp) + b1)
    h = jnp.tanh(jnp.dot(h, w2, precision=hp) + b2)
    return jnp.dot(h, w3, precision=hp) + b3


if __name__ == "__main__":
    key = jax.random.PRNGKey(0)
    kx, kp = jax.random.split(key)

    batch, input_dim, hidden_dim = 8, 32, [64, 64]
    x = jax.random.normal(kx, (batch, input_dim), jnp.float32)
    params = init_params(kp, input_dim, hidden_dim)

    ref = reference_forward(x, params)

    # f32 MXU path (HIGHEST precision): exact-semantics check of the fused kernel.
    p_f32 = prepare_params(params, compute_dtype=jnp.float32)
    v_f32 = jax.block_until_ready(ppo_critic_forward(x, p_f32))
    assert v_f32.shape == (batch, 1)
    assert jnp.allclose(v_f32, ref, atol=1e-5, rtol=1e-5)

    # bf16-MXU path (f32 accumulation, bf16 tanh epilogue): looser tolerance.
    p_bf16 = prepare_params(params, compute_dtype=jnp.bfloat16)
    v_bf16 = jax.block_until_ready(ppo_critic_forward(x, p_bf16))
    assert v_bf16.shape == (batch, 1)
    assert jnp.allclose(v_bf16, ref, atol=1e-1, rtol=1e-1)

    print("KERNEL_OK")
</pallas_src>

<mosaic_0001>
module attributes {stable_mosaic.version = 11 : i64} {
  func.func @ppo_critic_kernel(%arg0: i32, %arg1: memref<128x32xf32, #tpu.memory_space<vmem>>, %arg2: memref<32x128xf32, #tpu.memory_space<vmem>>, %arg3: memref<1x128xf32, #tpu.memory_space<vmem>>, %arg4: memref<128x128xf32, #tpu.memory_space<vmem>>, %arg5: memref<1x128xf32, #tpu.memory_space<vmem>>, %arg6: memref<1x128xf32, #tpu.memory_space<vmem>>, %arg7: memref<1xf32, #tpu.memory_space<smem>>, %arg8: memref<1x1x128xf32, #tpu.memory_space<vmem>>) attributes {dimension_semantics = [#tpu.dimension_semantics<parallel>], iteration_bounds = array<i64: 1>, scalar_prefetch = 0 : i64, scratch_operands = 0 : i64, tpu.core_type = #tpu.core_type<tc>, window_params = [{transform_indices = @transform_0, window_bounds = array<i64: 128, 32>}, {pipeline_mode = #tpu.pipeline_mode<synchronous>, transform_indices = @transform_1, window_bounds = array<i64: 32, 128>}, {pipeline_mode = #tpu.pipeline_mode<synchronous>, transform_indices = @transform_2, window_bounds = array<i64: 1, 128>}, {pipeline_mode = #tpu.pipeline_mode<synchronous>, transform_indices = @transform_3, window_bounds = array<i64: 128, 128>}, {pipeline_mode = #tpu.pipeline_mode<synchronous>, transform_indices = @transform_4, window_bounds = array<i64: 1, 128>}, {pipeline_mode = #tpu.pipeline_mode<synchronous>, transform_indices = @transform_5, window_bounds = array<i64: 1, 128>}, {transform_indices = @transform_6, window_bounds = array<i64: 1>}, {transform_indices = @transform_7, window_bounds = array<i64: 1, 1, 128>}]} {
    %c0 = arith.constant 0 : index
    %c0_0 = arith.constant 0 : index
    %0 = vector.load %arg1[%c0, %c0_0] : memref<128x32xf32, #tpu.memory_space<vmem>>, vector<128x32xf32>
    %c0_1 = arith.constant 0 : index
    %c0_2 = arith.constant 0 : index
    %1 = vector.load %arg2[%c0_1, %c0_2] : memref<32x128xf32, #tpu.memory_space<vmem>>, vector<32x128xf32>
    %cst = arith.constant dense<0.000000e+00> : vector<128x128xf32>
    %2 = tpu.matmul %0, %1, %cst {dimension_numbers = #tpu.dot_dimension_numbers<[1], [0], [0], [1], [0, 0, 1, 1], [], []>, precision = #tpu.contract_precision<fp32>} : vector<128x32xf32>, vector<32x128xf32>, vector<128x128xf32> -> vector<128x128xf32>
    %c0_3 = arith.constant 0 : index
    %c0_4 = arith.constant 0 : index
    %3 = vector.load %arg3[%c0_3, %c0_4] : memref<1x128xf32, #tpu.memory_space<vmem>>, vector<1x128xf32>
    %4 = vector.broadcast %3 : vector<1x128xf32> to vector<128x128xf32>
    %5 = arith.addf %2, %4 : vector<128x128xf32>
    %6 = math.tanh %5 : vector<128x128xf32>
    %c0_5 = arith.constant 0 : index
    %c0_6 = arith.constant 0 : index
    %7 = vector.load %arg4[%c0_5, %c0_6] : memref<128x128xf32, #tpu.memory_space<vmem>>, vector<128x128xf32>
    %cst_7 = arith.constant dense<0.000000e+00> : vector<128x128xf32>
    %8 = tpu.matmul %6, %7, %cst_7 {dimension_numbers = #tpu.dot_dimension_numbers<[1], [0], [0], [1], [0, 0, 1, 1], [], []>, precision = #tpu.contract_precision<fp32>} : vector<128x128xf32>, vector<128x128xf32>, vector<128x128xf32> -> vector<128x128xf32>
    %c0_8 = arith.constant 0 : index
    %c0_9 = arith.constant 0 : index
    %9 = vector.load %arg5[%c0_8, %c0_9] : memref<1x128xf32, #tpu.memory_space<vmem>>, vector<1x128xf32>
    %10 = vector.broadcast %9 : vector<1x128xf32> to vector<128x128xf32>
    %11 = arith.addf %8, %10 : vector<128x128xf32>
    %12 = math.tanh %11 : vector<128x128xf32>
    %c0_10 = arith.constant 0 : index
    %c0_11 = arith.constant 0 : index
    %13 = vector.load %arg6[%c0_10, %c0_11] : memref<1x128xf32, #tpu.memory_space<vmem>>, vector<1x128xf32>
    %c0_12 = arith.constant 0 : index
    %14 = memref.load %arg7[%c0_12] : memref<1xf32, #tpu.memory_space<smem>>
    %15 = tpu.iota {dimensions = array<i32: 0>} : vector<128x128xi32>
    %16 = tpu.iota {dimensions = array<i32: 1>} : vector<128x128xi32>
    %17 = arith.cmpi eq, %15, %16 : vector<128x128xi32>
    %18 = arith.extui %17 : vector<128x128xi1> to vector<128x128xi32>
    %19 = arith.sitofp %18 : vector<128x128xi32> to vector<128x128xf32>
    %20 = vector.broadcast %13 : vector<1x128xf32> to vector<128x128xf32>
    %21 = arith.mulf %12, %20 : vector<128x128xf32>
    %cst_13 = arith.constant dense<0.000000e+00> : vector<128xf32>
    %22 = vector.multi_reduction <add>, %21, %cst_13 [1] : vector<128x128xf32> to vector<128xf32>
    %23 = vector.shape_cast %22 : vector<128xf32> to vector<128x1xf32>
    %24 = vector.broadcast %23 : vector<128x1xf32> to vector<128x128xf32>
    %25 = arith.mulf %24, %19 : vector<128x128xf32>
    %cst_14 = arith.constant dense<0.000000e+00> : vector<128xf32>
    %26 = vector.multi_reduction <add>, %25, %cst_14 [0] : vector<128x128xf32> to vector<128xf32>
    %27 = vector.shape_cast %26 : vector<128xf32> to vector<1x128xf32>
    %28 = vector.broadcast %14 : f32 to vector<1x128xf32>
    %29 = arith.addf %27, %28 : vector<1x128xf32>
    %c0_15 = arith.constant 0 : index
    %c0_16 = arith.constant 0 : index
    %c0_17 = arith.constant 0 : index
    %30 = vector.load %arg8[%c0_15, %c0_16, %c0_17] : memref<1x1x128xf32, #tpu.memory_space<vmem>>, vector<1x1x128xf32>
    %31 = vector.shape_cast %30 : vector<1x1x128xf32> to vector<1x128xf32>
    %32 = vector.shape_cast %29 : vector<1x128xf32> to vector<1x1x128xf32>
    tpu.vector_store %arg8[%c0_15, %c0_16, %c0_17], %32 {strides = array<i32>} : memref<1x1x128xf32, #tpu.memory_space<vmem>>, vector<1x1x128xf32>,
    return
  }
  func.func @transform_0(%arg0: i32) -> (i32, i32) {
    %c0_i32 = arith.constant 0 : i32
    %c0_i32_0 = arith.constant 0 : i32
    return %arg0, %c0_i32 : i32, i32
  }
  func.func @transform_1(%arg0: i32) -> (i32, i32) {
    %c0_i32 = arith.constant 0 : i32
    %c0_i32_0 = arith.constant 0 : i32
    %c0_i32_1 = arith.constant 0 : i32
    return %c0_i32, %c0_i32_0 : i32, i32
  }
  func.func @transform_2(%arg0: i32) -> (i32, i32) {
    %c0_i32 = arith.constant 0 : i32
    %c0_i32_0 = arith.constant 0 : i32
    %c0_i32_1 = arith.constant 0 : i32
    return %c0_i32, %c0_i32_0 : i32, i32
  }
  func.func @transform_3(%arg0: i32) -> (i32, i32) {
    %c0_i32 = arith.constant 0 : i32
    %c0_i32_0 = arith.constant 0 : i32
    %c0_i32_1 = arith.constant 0 : i32
    return %c0_i32, %c0_i32_0 : i32, i32
  }
  func.func @transform_4(%arg0: i32) -> (i32, i32) {
    %c0_i32 = arith.constant 0 : i32
    %c0_i32_0 = arith.constant 0 : i32
    %c0_i32_1 = arith.constant 0 : i32
    return %c0_i32, %c0_i32_0 : i32, i32
  }
  func.func @transform_5(%arg0: i32) -> (i32, i32) {
    %c0_i32 = arith.constant 0 : i32
    %c0_i32_0 = arith.constant 0 : i32
    %c0_i32_1 = arith.constant 0 : i32
    return %c0_i32, %c0_i32_0 : i32, i32
  }
  func.func @transform_6(%arg0: i32) -> i32 {
    %c0_i32 = arith.constant 0 : i32
    %c0_i32_0 = arith.constant 0 : i32
    return %c0_i32 : i32
  }
  func.func @transform_7(%arg0: i32) -> (i32, i32, i32) {
    %c0_i32 = arith.constant 0 : i32
    %c0_i32_0 = arith.constant 0 : i32
    %c0_i32_1 = arith.constant 0 : i32
    return %arg0, %c0_i32, %c0_i32_0 : i32, i32, i32
  }
}

</mosaic_0001>

<bundles_post_ra>
// kernel: tpu_custom_call.1
= control target key start
LH: loop header
LB: loop body
LE: loop exit
PB: predicated region body
PF: predicated region fallthrough
CT: control target
= control target key end

     0   :  { %vm55_vm0 = vcmask 261120   ;;  %s5329_s0 = inlined_call_operand.vmem [shape: f32[128,32], index: 0, kind: input, shape index: {}]   ;;  %s5330_s1 = inlined_call_operand.vmem [shape: f32[32,128], index: 1, kind: input, shape index: {}]   ;;  %s5331_s2 = inlined_call_operand.vmem [shape: f32[1,128], index: 2, kind: input, shape index: {}]   ;;  %s5332_s3 = inlined_call_operand.vmem [shape: f32[128,128], index: 3, kind: input, shape index: {}]   ;;  %s5333_s4 = inlined_call_operand.vmem [shape: f32[1,128], index: 4, kind: input, shape index: {}]   ;;  %s5334_s5 = inlined_call_operand.vmem [shape: f32[1,128], index: 5, kind: input, shape index: {}]   ;;  %s5335_s6 = inlined_call_operand.<no memory space> [shape: f32[1], index: 6, kind: input, shape index: {}]   ;;  %s5336_s7 = inlined_call_operand.hbm [shape: f32[1,1,128], index: 7, kind: output, shape index: {}]  }
   0x1   :  { %v44_v0 = vld [vmem:[%s5330_s1] sm:$0xff]  ;;  %v45_v1 = vld [vmem:[%s5330_s1 + $0x8] sm:$0xff]  ;;  %v4200_v2 = vld [vmem:[%s5330_s1 + $0x10] sm:$0xff] }
   0x2   :  { %v105_v3 = vand.u32 4294901760, %v44_v0  ;;  %v108_v4 = vand.u32 4294901760, %v45_v1  ;;  %v4205_v5 = vld [vmem:[%s5330_s1 + $0x18] sm:$0xff]  ;;  %v111_v6 = vand.u32 4294901760, %v4200_v2  ;;  %v28_v7 = vld [vmem:[%s5329_s0] sm:$0xff]  ;;  %v29_v8 = vld [vmem:[%s5329_s0 + $0x8] sm:$0xff] }
   0x3   :  { %v114_v9 = vand.u32 4294901760, %v4205_v5  ;;  %v57_v10 = vsel %vm55_vm0, %v28_v7, 0  ;;  %v60_v11 = vsel %vm55_vm0, %v29_v8, 0  ;;  %v30_v12 = vld [vmem:[%s5329_s0 + $0x10] sm:$0xff]  ;;  %v31_v13 = vld [vmem:[%s5329_s0 + $0x18] sm:$0xff]  ;;  %v32_v18 = vld [vmem:[%s5329_s0 + $0x20] sm:$0xff] }
   0x4   :  { %v4223_v14 = vpack.c.bf16 %v108_v4, %v105_v3  ;;  %v4225_v15 = vand.u32 4294901760, %v57_v10  ;;  %v4227_v16 = vand.u32 4294901760, %v60_v11  ;;  %v4229_v17 = vsub.f32 %v44_v0, %v105_v3  ;;  %v33_v19 = vld [vmem:[%s5329_s0 + $0x28] sm:$0xff] }
   0x5   :  { %v4241_v20 = vpack.c.bf16 %v114_v9, %v111_v6  ;;  %v4243_v21 = vsub.f32 %v45_v1, %v108_v4  ;;  %v63_v22 = vsel %vm55_vm0, %v30_v12, 0  ;;  %v66_v23 = vsel %vm55_vm0, %v31_v13, 0 }
   0x6   :  { %3612 = vmatprep.subr.bf16.mxu0 %v4223_v14  ;;  %v4249_v24 = vsub.f32 %v57_v10, %v4225_v15  ;;  %v4252_v25 = vsub.f32 %v60_v11, %v4227_v16  ;;  %v336_v26 = vand.u32 4294901760, %v4229_v17  ;;  %v4255_v27 = vand.u32 4294901760, %v63_v22 }
   0x7   :  { %3614 = vmatpush3.bf16.msra.mxu0 %v4223_v14  ;;  %v343_v28 = vand.u32 4294901760, %v4243_v21  ;;  %v4259_v29 = vand.u32 4294901760, %v66_v23  ;;  %v69_v30 = vsel %vm55_vm0, %v32_v18, 0  ;;  %v72_v31 = vsel %vm55_vm0, %v33_v19, 0 }
   0x8   :  { %3616 = vmatprep.subr.bf16.mxu0 %v4241_v20  ;;  %v175_v32 = vand.u32 4294901760, %v4249_v24  ;;  %v185_v33 = vand.u32 4294901760, %v4252_v25  ;;  %v337_v34 = vsub.f32 %v4229_v17, %v336_v26  ;;  %v4270_v35 = vsub.f32 %v63_v22, %v4255_v27 }
   0x9   :  { %13 = vsyncpa [#allocation4], 0  ;;  %v344_v36 = vsub.f32 %v4243_v21, %v343_v28  ;;  %v4276_v37 = vsub.f32 %v66_v23, %v4259_v29  ;;  %v4278_v38 = vand.u32 4294901760, %v69_v30  ;;  %v4280_v39 = vand.u32 4294901760, %v72_v31  ;;  %v34_v40 = vld [vmem:[%s5329_s0 + $0x30] sm:$0xff]  ;;  %v35_v49 = vld [vmem:[%s5329_s0 + $0x38] sm:$0xff] }
   0xa   :  { %v176_v41 = vsub.f32 %v4249_v24, %v175_v32  ;;  %v186_v42 = vsub.f32 %v4252_v25, %v185_v33  ;;  %v338_v43 = vand.u32 4294901760, %v337_v34  ;;  %v195_v44 = vand.u32 4294901760, %v4270_v35  ;;  %v36_v50 = vld [vmem:[%s5329_s0 + $0x40] sm:$0xff]  ;;  %v37_v59 = vld [vmem:[%s5329_s0 + $0x48] sm:$0xff]  ;;  %v38_v12 = vld [vmem:[%s5329_s0 + $0x50] sm:$0xff]  ;;  %s4150_s26 = smov [#allocation3]  }
   0xb   :  { %3618 = vmatpush3.bf16.msra.mxu0 %v4241_v20  ;;  %v345_v45 = vand.u32 4294901760, %v344_v36  ;;  %v205_v46 = vand.u32 4294901760, %v4276_v37  ;;  %v4295_v47 = vsub.f32 %v69_v30, %v4278_v38  ;;  %v4298_v48 = vsub.f32 %v72_v31, %v4280_v39  ;;  %v39_v13 = vld [vmem:[%s5329_s0 + $0x58] sm:$0xff]  ;;  %s2744_s27 = sshll.u32 %s4150_s26, 4  ;;  %s2745_s27 = int_to_ptr.vmem [resolvable:$true] %s2744_s27 }
   0xc   :  { %v177_v51 = vand.u32 4294901760, %v176_v41  ;;  %v187_v52 = vand.u32 4294901760, %v186_v42  ;;  %v196_v53 = vsub.f32 %v4270_v35, %v195_v44  ;;  %v75_v54 = vsel %vm55_vm0, %v34_v40, 0  ;;  %s4125_s28 = scalar_lea.vmem %s2745_s27, 16  ;;  %s4129_s29 = scalar_lea.vmem %s2745_s27, 32 }
   0xd   :  { %v3619_v55 = vpack.c.bf16 %v345_v45, %v338_v43  ;;  %v206_v56 = vsub.f32 %v4276_v37, %v205_v46  ;;  %v215_v57 = vand.u32 4294901760, %v4295_v47  ;;  %v225_v58 = vand.u32 4294901760, %v4298_v48  ;;  %p4126_p0 = scmp.ne.s32.totalorder %s2745_s27, %s4125_s28  ;;  %p4130_p1 = scmp.lt.s32.totalorder %s2745_s27, %s2745_s27 }
   0xe   :  { %3091 = vmatprep.mubr.f32.mxu0 %v177_v51  ;;  %v197_v60 = vand.u32 4294901760, %v196_v53  ;;  %v4318_v61 = vand.u32 4294901760, %v75_v54  ;;  %v78_v62 = vsel %vm55_vm0, %v35_v49, 0  ;;  %v81_v63 = vsel %vm55_vm0, %v36_v50, 0  ;;  %v41_v53 = vld [vmem:[%s5329_s0 + $0x68] sm:$0xff]  ;;  %p4131_p2 = scmp.lt.s32.totalorder %s4129_s29, %s4125_s28 }
   0xf   :  { %3092 = vmatmul.mubr.f32.vlgmr.msra.gmra.mrb[0].mxu0 %v187_v52  ;;  %3620 = vmatprep.subr.bf16.mxu0 %v3619_v55  ;;  %v207_v0 = vand.u32 4294901760, %v206_v56  ;;  %v216_v1 = vsub.f32 %v4295_v47, %v215_v57  ;;  %v226_v3 = vsub.f32 %v4298_v48, %v225_v58  ;;  %v4328_v4 = vand.u32 4294901760, %v78_v62  ;;  %v40_v52 = vld [vmem:[%s5329_s0 + $0x60] sm:$0xff] }
  0x10   :  { %3622 = vmatpush3.bf16.msra.mxu0 %v3619_v55  ;;  %3094 = vmatprep.mubr.f32.mxu0 %v197_v60  ;;  %v4331_v7 = vsub.f32 %v75_v54, %v4318_v61  ;;  %v4333_v8 = vand.u32 4294901760, %v81_v63  ;;  %v84_v10 = vsel %vm55_vm0, %v37_v59, 0  ;;  %v4339_v11 = vsub.f32 %v4200_v2, %v111_v6  ;;  %p4132_p3 = por %p4131_p2, %p4130_p1 }
  0x11   :  { %v217_v18 = vand.u32 4294901760, %v216_v1  ;;  %v227_v19 = vand.u32 4294901760, %v226_v3  ;;  %v4348_v22 = vsub.f32 %v78_v62, %v4328_v4  ;;  %v4350_v23 = vand.u32 4294901760, %v84_v10  ;;  %v42_v1 = vld [vmem:[%s5329_s0 + $0x70] sm:$0xff]  ;;  %v43_v3 = vld [vmem:[%s5329_s0 + $0x78] sm:$0xff] }
  0x12   :  { %v235_v30 = vand.u32 4294901760, %v4331_v7  ;;  %v4354_v2 = vsub.f32 %v81_v63, %v4333_v8  ;;  %v350_v6 = vand.u32 4294901760, %v4339_v11  ;;  %v4360_v31 = vsub.f32 %v4205_v5, %v114_v9  ;;  %p4133_p4 = pnand %p4132_p3, %p4126_p0 }
  0x13   :  { %3095 = vmatmul.mubr.f32.gmra.mrb[2].mxu0 %v207_v0  ;;  %v245_v34 = vand.u32 4294901760, %v4348_v22  ;;  %v4364_v36 = vsub.f32 %v84_v10, %v4350_v23  ;;  %v87_v40 = vsel %vm55_vm0, %v38_v12, 0  ;;  %v90_v41 = vsel %vm55_vm0, %v39_v13, 0 }
  0x14   :  { %3097 = vmatprep.mubr.f32.mxu0 %v217_v18  ;;  %v236_v42 = vsub.f32 %v4331_v7, %v235_v30  ;;  %v255_v43 = vand.u32 4294901760, %v4354_v2  ;;  %v351_v5 = vsub.f32 %v4339_v11, %v350_v6  ;;  %v357_v9 = vand.u32 4294901760, %v4360_v31 }
  0x15   :  { %v246_v45 = vsub.f32 %v4348_v22, %v245_v34  ;;  %v5337_v49 = vand.u32 4294901760, %v4364_v36  ;;  %v4378_v50 = vand.u32 4294901760, %v87_v40  ;;  %v4380_v51 = vand.u32 4294901760, %v90_v41 }
  0x16   :  { %v237_v54 = vand.u32 4294901760, %v236_v42  ;;  %v256_v55 = vsub.f32 %v4354_v2, %v255_v43  ;;  %v352_v56 = vand.u32 4294901760, %v351_v5  ;;  %v358_v59 = vsub.f32 %v4360_v31, %v357_v9 }
  0x17   :  { %3098 = vmatmul.mubr.f32.gmra.mrb[4].mxu0 %v227_v19  ;;  %v247_v60 = vand.u32 4294901760, %v246_v45  ;;  %v266_v62 = vsub.f32 %v4364_v36, %v5337_v49  ;;  %v4396_v63 = vsub.f32 %v87_v40, %v4378_v50  ;;  %v4399_v0 = vsub.f32 %v90_v41, %v4380_v51 }
  0x18   :  { %3100 = vmatprep.mubr.f32.mxu0 %v237_v54  ;;  %v257_v10 = vand.u32 4294901760, %v256_v55  ;;  %v359_v12 = vand.u32 4294901760, %v358_v59  ;;  %v93_v13 = vsel %vm55_vm0, %v40_v52, 0  ;;  %v96_v18 = vsel %vm55_vm0, %v41_v53, 0 }
  0x19   :  { %v267_v19 = vand.u32 4294901760, %v266_v62  ;;  %v275_v40 = vand.u32 4294901760, %v4396_v63  ;;  %v5338_v41 = vand.u32 4294901760, %v4399_v0  ;;  %v4411_v42 = vand.u32 4294901760, %v93_v13 }
  0x1a   :  { %v3623_v5 = vpack.c.bf16 %v359_v12, %v352_v56  ;;  %v4413_v45 = vand.u32 4294901760, %v96_v18  ;;  %v99_v49 = vsel %vm55_vm0, %v42_v1, 0  ;;  %v102_v54 = vsel %vm55_vm0, %v43_v3, 0 }
  0x1b   :  { %3101 = vmatmul.mubr.f32.gmra.mrb[6].mxu0 %v247_v60  ;;  %v276_v52 = vsub.f32 %v4396_v63, %v275_v40  ;;  %v286_v53 = vsub.f32 %v4399_v0, %v5338_v41  ;;  %v4424_v55 = vsub.f32 %v93_v13, %v4411_v42  ;;  %v4426_v59 = vand.u32 4294901760, %v99_v49 }
  0x1c   :  { %3103 = vmatprep.mubr.f32.mxu0 %v257_v10  ;;  %3624 = vmatprep.subr.bf16.mxu0 %v3623_v5  ;;  %v4429_v56 = vsub.f32 %v96_v18, %v4413_v45  ;;  %v4431_v62 = vand.u32 4294901760, %v102_v54  ;;  %v3627_v60 = vpack.c.bf16 %v4243_v21, %v4229_v17  ;;  %v4447_v18 = vpack.c.bf16 %v343_v28, %v336_v26 }
  0x1d   :  { %3626 = vmatpush3.bf16.msra.mxu0 %v3623_v5  ;;  %v277_v1 = vand.u32 4294901760, %v276_v52  ;;  %v295_v3 = vand.u32 4294901760, %v4424_v55  ;;  %v4437_v12 = vsub.f32 %v99_v49, %v4426_v59  ;;  %v4449_v41 = vpack.c.bf16 %v357_v9, %v350_v6 }
  0x1e   :  { %v305_v13 = vand.u32 4294901760, %v4429_v56  ;;  %v4441_v10 = vsub.f32 %v102_v54, %v4431_v62  ;;  %3628 = vmatprep.subr.bf16.mxu0 %v3627_v60  ;;  %v287_v5 = vand.u32 4294901760, %v286_v53  ;;  %v3631_v53 = vpack.c.bf16 %v4360_v31, %v4339_v11  ;;  %v4487_v11 = vld [vmem:[%s5332_s3] sm:$0xff]  ;;  %v4492_v31 = vld [vmem:[%s5332_s3 + $0x8] sm:$0xff] }
  0x1f   :  { %3104 = vmatmul.mubr.f32.gmra.mrb[8].mxu0 %v267_v19  ;;  %v296_v49 = vsub.f32 %v4424_v55, %v295_v3  ;;  %v5344_v52 = vand.u32 4294901760, %v4437_v12 }
  0x20   :  { %3106 = vmatprep.mubr.f32.mxu0 %v277_v1  ;;  %v306_v54 = vsub.f32 %v4429_v56, %v305_v13  ;;  %v5343_v17 = vand.u32 4294901760, %v4441_v10  ;;  %v5340_v1 = vand.u32 4294901760, %v4487_v11 }
  0x21   :  { %v297_v21 = vand.u32 4294901760, %v296_v49  ;;  %v316_v26 = vsub.f32 %v4437_v12, %v5344_v52  ;;  %v4505_v49 = vld [vmem:[%s5332_s3 + $0x18] sm:$0xff] }
  0x22   :  { %v307_v28 = vand.u32 4294901760, %v306_v54  ;;  %v326_v6 = vsub.f32 %v4441_v10, %v5343_v17 }
  0x23   :  { %3107 = vmatmul.mubr.f32.gmra.mrb[10].mxu0 %v287_v5  ;;  %v317_v9 = vand.u32 4294901760, %v316_v26  ;;  %v5339_v5 = vand.u32 4294901760, %v4492_v31  ;;  %v4512_v26 = vld [vmem:[%s5332_s3 + $0x20] sm:$0xff] }
  0x24   :  { %3109 = vmatprep.mubr.f32.mxu0 %v297_v21  ;;  %v327_v19 = vand.u32 4294901760, %v326_v6  ;;  %v5341_v21 = vand.u32 4294901760, %v4505_v49 }
  0x25   :  { %v4524_v6 = vpack.c.bf16 %v5339_v5, %v5340_v1  ;;  %v4542_v5 = vld [vmem:[%s5332_s3 + $0x30] sm:$0xff]  ;;  %v4547_v1 = vld [vmem:[%s5332_s3 + $0x38] sm:$0xff] }
  0x26   :  { %v1295_v17 = vand.u32 4294901760, %v4547_v1 }
  0x27   :  { %3110 = vmatmul.mubr.f32.gmra.mrb[12].mxu0 %v307_v28  ;;  %v4517_v28 = vld [vmem:[%s5332_s3 + $0x28] sm:$0xff]  ;;  %3660 = vmatprep.subr.bf16.mxu1 %v4524_v6 }
  0x28   :  { %3112 = vmatprep.mubr.f32.mxu0 %v317_v9  ;;  %3662 = vmatpush3.bf16.msra.mxu1 %v4524_v6 }
  0x2b   :  { %3113 = vmatmul.mubr.f32.gmra.mrb[14].mxu0 %v327_v19  ;;  %v1286_v19 = vand.u32 4294901760, %v4512_v26 }
  0x2c   :  { %3123 = vmatprep.mubr.f32.mxu0 %v4225_v15 }
  0x2f   :  { %3124 = vmatmul.mubr.f32.vlgmr.msra.gmra.mrb[0].mxu0 %v4227_v16 }
  0x30   :  { %3630 = vmatpush3.bf16.msra.mxu0 %v3627_v60  ;;  %3126 = vmatprep.mubr.f32.mxu0 %v4255_v27  ;;  %v4497_v60 = vld [vmem:[%s5332_s3 + $0x10] sm:$0xff] }
  0x31   :  { %3632 = vmatprep.subr.bf16.mxu0 %v3631_v53  ;;  %v5342_v54 = vand.u32 4294901760, %v4497_v60 }
  0x33   :  { %3127 = vmatmul.mubr.f32.gmra.mrb[2].mxu0 %v4259_v29  ;;  %v4533_v9 = vpack.c.bf16 %v5341_v21, %v5342_v54  ;;  %v1292_v54 = vand.u32 4294901760, %v4542_v5 }
  0x34   :  { %3129 = vmatprep.mubr.f32.mxu0 %v4278_v38  ;;  %3634 = vmatpush3.bf16.msra.mxu0 %v3631_v53  ;;  %v1289_v53 = vand.u32 4294901760, %v4517_v28 }
  0x35   :  { %3636 = vmatprep.subr.bf16.mxu0 %v4223_v14  ;;  %3664 = vmatprep.subr.bf16.mxu1 %v4533_v9  ;;  %v4570_v52 = vpack.c.bf16 %v1295_v17, %v1292_v54 }
  0x36   :  { %v4558_v21 = vpack.c.bf16 %v1289_v53, %v1286_v19  ;;  %3666 = vmatpush3.bf16.msra.mxu1 %v4533_v9 }
  0x37   :  { %3130 = vmatmul.mubr.f32.gmra.mrb[4].mxu0 %v4280_v39 }
  0x38   :  { %3132 = vmatprep.mubr.f32.mxu0 %v4318_v61  ;;  %3668 = vmatprep.subr.bf16.mxu1 %v4558_v21 }
  0x3a   :  { %3670 = vmatpush3.bf16.msra.mxu1 %v4558_v21 }
  0x3b   :  { %3133 = vmatmul.mubr.f32.gmra.mrb[6].mxu0 %v4328_v4  ;;  %3672 = vmatprep.subr.bf16.mxu1 %v4570_v52 }
  0x3c   :  { %3135 = vmatprep.mubr.f32.mxu0 %v4333_v8 }
  0x3e   :  { %3674 = vmatpush3.bf16.msra.mxu1 %v4570_v52 }
  0x3f   :  { %3136 = vmatmul.mubr.f32.gmra.mrb[8].mxu0 %v4350_v23 }
  0x40   :  { %3138 = vmatprep.mubr.f32.mxu0 %v4378_v50 }
  0x43   :  { %3139 = vmatmul.mubr.f32.gmra.mrb[10].mxu0 %v4380_v51 }
  0x44   :  { %3141 = vmatprep.mubr.f32.mxu0 %v4411_v42 }
  0x47   :  { %3142 = vmatmul.mubr.f32.gmra.mrb[12].mxu0 %v4413_v45 }
  0x48   :  { %3144 = vmatprep.mubr.f32.mxu0 %v4426_v59 }
  0x4b   :  { %3145 = vmatmul.mubr.f32.gmra.mrb[14].mxu0 %v4431_v62 }
  0x4c   :  { %3155 = vmatprep.mubr.f32.mxu0 %v4249_v24  ;;  %v5386_v24 = vand.u32 4294901760, %v4364_v36 }
  0x4f   :  { %3156 = vmatmul.mubr.f32.vlgmr.msra.gmra.mrb[0].mxu0 %v4252_v25  ;;  %v5387_v25 = vand.u32 4294901760, %v4399_v0 }
  0x50   :  { %3638 = vmatpush3.bf16.msra.mxu0 %v4223_v14  ;;  %3158 = vmatprep.mubr.f32.mxu0 %v4270_v35  ;;  %v1261_v35 = vld [vmem:[%s5332_s3 + $0x58] sm:$0xff] }
  0x51   :  { %3640 = vmatprep.subr.bf16.mxu0 %v4241_v20 }
  0x53   :  { %3159 = vmatmul.mubr.f32.gmra.mrb[2].mxu0 %v4276_v37 }
  0x54   :  { %3161 = vmatprep.mubr.f32.mxu0 %v4295_v47  ;;  %3642 = vmatpush3.bf16.msra.mxu0 %v4241_v20 }
  0x55   :  { %3644 = vmatprep.subr.bf16.mxu0 %v4447_v18 }
  0x57   :  { %3162 = vmatmul.mubr.f32.gmra.mrb[4].mxu0 %v4298_v48 }
  0x58   :  { %3164 = vmatprep.mubr.f32.mxu0 %v4331_v7 }
  0x5b   :  { %3165 = vmatmul.mubr.f32.gmra.mrb[6].mxu0 %v4348_v22  ;;  %v5391_v22 = vand.u32 4294901760, %v4487_v11 }
  0x5c   :  { %3167 = vmatprep.mubr.f32.mxu0 %v4354_v2 }
  0x5f   :  { %3168 = vmatmul.mubr.f32.gmra.mrb[8].mxu0 %v4364_v36 }
  0x60   :  { %3170 = vmatprep.mubr.f32.mxu0 %v4396_v63 }
  0x63   :  { %3171 = vmatmul.mubr.f32.gmra.mrb[10].mxu0 %v4399_v0 }
  0x64   :  { %3173 = vmatprep.mubr.f32.mxu0 %v4424_v55 }
  0x67   :  { %3174 = vmatmul.mubr.f32.gmra.mrb[12].mxu0 %v4429_v56 }
  0x68   :  { %3176 = vmatprep.mubr.f32.mxu0 %v4437_v12 }
  0x6b   :  { %3177 = vmatmul.mubr.f32.gmra.mrb[14].mxu0 %v4441_v10 }
  0x6c   :  { %3187 = vmatprep.mubr.f32.mxu0 %v175_v32  ;;  %v5388_v32 = vand.u32 4294901760, %v4437_v12 }
  0x6f   :  { %3188 = vmatmul.mubr.f32.vlgmr.msra.gmra.mrb[0].mxu0 %v185_v33  ;;  %v5389_v33 = vand.u32 4294901760, %v4441_v10 }
  0x70   :  { %3646 = vmatpush3.bf16.msra.mxu0 %v4447_v18  ;;  %3190 = vmatprep.mubr.f32.mxu0 %v195_v44  ;;  %v1262_v44 = vld [vmem:[%s5332_s3 + $0x60] sm:$0xff] }
  0x71   :  { %3648 = vmatprep.subr.bf16.mxu0 %v4449_v41  ;;  %v1310_v47 = vand.u32 4294901760, %v1262_v44 }
  0x73   :  { %3191 = vmatmul.mubr.f32.gmra.mrb[2].mxu0 %v205_v46  ;;  %v1263_v46 = vld [vmem:[%s5332_s3 + $0x68] sm:$0xff] }
  0x74   :  { %3193 = vmatprep.mubr.f32.mxu0 %v215_v57  ;;  %3650 = vmatpush3.bf16.msra.mxu0 %v4449_v41  ;;  %v1313_v48 = vand.u32 4294901760, %v1263_v46 }
  0x75   :  { %3652 = vmatprep.subr.bf16.mxu0 %v4223_v14 }
  0x76   :  { %v4693_v57 = vpack.c.bf16 %v1313_v48, %v1310_v47 }
  0x77   :  { %3194 = vmatmul.mubr.f32.gmra.mrb[4].mxu0 %v225_v58  ;;  %v1264_v58 = vld [vmem:[%s5332_s3 + $0x70] sm:$0xff] }
  0x78   :  { %3196 = vmatprep.mubr.f32.mxu0 %v235_v30  ;;  %v5393_v30 = vand.u32 4294901760, %v4492_v31 }
  0x7a   :  { %v4719_v2 = vsub.f32 %v4492_v31, %v5393_v30  ;;  %v4755_v31 = vsub.f32 %v1262_v44, %v1310_v47 }
  0x7b   :  { %3197 = vmatmul.mubr.f32.gmra.mrb[6].mxu0 %v245_v34 }
  0x7c   :  { %3199 = vmatprep.mubr.f32.mxu0 %v255_v43  ;;  %5394 = vst [vmem:[#allocation8_spill] sm:$0xff] %v4719_v2  ;;  %v5360_v36 = vand.u32 4294901760, %v4719_v2  ;;  %5399 = vst [vmem:[#allocation13_spill] sm:$0xff] %v4755_v31 }
  0x7f   :  { %3200 = vmatmul.mubr.f32.gmra.mrb[8].mxu0 %v5386_v24  ;;  %v4757_v24 = vsub.f32 %v1263_v46, %v1313_v48 }
  0x80   :  { %3202 = vmatprep.mubr.f32.mxu0 %v275_v40 }
  0x81   :  { %5400 = vst [vmem:[#allocation14_spill] sm:$0xff] %v4757_v24 }
  0x83   :  { %3203 = vmatmul.mubr.f32.gmra.mrb[10].mxu0 %v5387_v25 }
  0x84   :  { %3205 = vmatprep.mubr.f32.mxu0 %v295_v3 }
  0x87   :  { %3206 = vmatmul.mubr.f32.gmra.mrb[12].mxu0 %v305_v13 }
  0x88   :  { %3208 = vmatprep.mubr.f32.mxu0 %v5388_v32 }
  0x8b   :  { %3209 = vmatmul.mubr.f32.gmra.mrb[14].mxu0 %v5389_v33  ;;  %v5348_v33 = vand.u32 4294901760, %v4755_v31 }
  0x8c   :  { %3219 = vmatprep.mubr.f32.mxu0 %v4225_v15 }
  0x8f   :  { %3220 = vmatmul.mubr.f32.vlgmr.msra.gmra.mrb[0].mxu0 %v4227_v16 }
  0x90   :  { %3654 = vmatpush3.bf16.msra.mxu0 %v4223_v14  ;;  %3222 = vmatprep.mubr.f32.mxu0 %v4255_v27  ;;  %v1258_v14 = vld [vmem:[%s5332_s3 + $0x40] sm:$0xff] }
  0x91   :  { %3656 = vmatprep.subr.bf16.mxu0 %v4241_v20 }
  0x93   :  { %3223 = vmatmul.mubr.f32.gmra.mrb[2].mxu0 %v4259_v29 }
  0x94   :  { %3225 = vmatprep.mubr.f32.mxu0 %v4278_v38  ;;  %3658 = vmatpush3.bf16.msra.mxu0 %v4241_v20 }
  0x95   :  { %3820 = vmatprep.subr.bf16.mxu0 %v4524_v6 }
  0x97   :  { %3226 = vmatmul.mubr.f32.gmra.mrb[4].mxu0 %v4280_v39 }
  0x98   :  { %3228 = vmatprep.mubr.f32.mxu0 %v4318_v61 }
  0x9b   :  { %3229 = vmatmul.mubr.f32.gmra.mrb[6].mxu0 %v4328_v4 }
  0x9c   :  { %3231 = vmatprep.mubr.f32.mxu0 %v4333_v8 }
  0x9f   :  { %3232 = vmatmul.mubr.f32.gmra.mrb[8].mxu0 %v4350_v23 }
  0xa0   :  { %3234 = vmatprep.mubr.f32.mxu0 %v4378_v50 }
  0xa3   :  { %3235 = vmatmul.mubr.f32.gmra.mrb[10].mxu0 %v4380_v51 }
  0xa4   :  { %3237 = vmatprep.mubr.f32.mxu0 %v4411_v42 }
  0xa7   :  { %3238 = vmatmul.mubr.f32.gmra.mrb[12].mxu0 %v4413_v45 }
  0xa8   :  { %3240 = vmatprep.mubr.f32.mxu0 %v4426_v59 }
  0xab   :  { %3241 = vmatmul.mubr.f32.gmra.mrb[14].mxu0 %v4431_v62 }
  0xac   :  { %3251 = vmatprep.mubr.f32.mxu0 %v4225_v15  ;;  %v1259_v15 = vld [vmem:[%s5332_s3 + $0x48] sm:$0xff] }
  0xad   :  { %v1301_v20 = vand.u32 4294901760, %v1259_v15 }
  0xaf   :  { %3252 = vmatmul.mubr.f32.vlgmr.msra.gmra.mrb[0].mxu0 %v4227_v16  ;;  %v1298_v16 = vand.u32 4294901760, %v1258_v14  ;;  %v4734_v41 = vsub.f32 %v1259_v15, %v1301_v20 }
  0xb0   :  { %3254 = vmatprep.mubr.f32.mxu0 %v4255_v27  ;;  %3822 = vmatpush3.bf16.msra.mxu0 %v4524_v6 }
  0xb1   :  { %3824 = vmatprep.subr.bf16.mxu0 %v4533_v9  ;;  %v4669_v27 = vpack.c.bf16 %v1301_v20, %v1298_v16  ;;  %v4732_v40 = vsub.f32 %v1258_v14, %v1298_v16  ;;  %5396 = vst [vmem:[#allocation10_spill] sm:$0xff] %v4734_v41  ;;  %v5347_v14 = vand.u32 4294901760, %v4757_v24  ;;  %v1602_v16 = vsub.f32 %v4755_v31, %v5348_v33 }
  0xb3   :  { %3255 = vmatmul.mubr.f32.gmra.mrb[2].mxu0 %v4259_v29  ;;  %v1260_v29 = vld [vmem:[%s5332_s3 + $0x50] sm:$0xff]  ;;  %3676 = vmatprep.subr.bf16.mxu1 %v4669_v27  ;;  %5395 = vst [vmem:[#allocation9_spill] sm:$0xff] %v4732_v40  ;;  %v1609_v20 = vsub.f32 %v4757_v24, %v5347_v14 }
  0xb4   :  { %3257 = vmatprep.mubr.f32.mxu0 %v4278_v38  ;;  %3826 = vmatpush3.bf16.msra.mxu0 %v4533_v9  ;;  %v1304_v37 = vand.u32 4294901760, %v1260_v29  ;;  %v1307_v38 = vand.u32 4294901760, %v1261_v35 }
  0xb5   :  { %3828 = vmatprep.subr.bf16.mxu0 %v4558_v21  ;;  %3678 = vmatpush3.bf16.msra.mxu1 %v4669_v27  ;;  %v1610_v44 = vand.u32 4294901760, %v1609_v20 }
  0xb6   :  { %v4744_v56 = vsub.f32 %v1260_v29, %v1304_v37 }
  0xb7   :  { %3258 = vmatmul.mubr.f32.gmra.mrb[4].mxu0 %v4280_v39  ;;  %v4681_v39 = vpack.c.bf16 %v1307_v38, %v1304_v37 }
  0xb8   :  { %3260 = vmatprep.mubr.f32.mxu0 %v4318_v61  ;;  %3830 = vmatpush3.bf16.msra.mxu0 %v4558_v21  ;;  %v1265_v61 = vld [vmem:[%s5332_s3 + $0x78] sm:$0xff]  ;;  %5397 = vst [vmem:[#allocation11_spill] sm:$0xff] %v4744_v56  ;;  %v5350_v13 = vand.u32 4294901760, %v4744_v56 }
  0xb9   :  { %3832 = vmatprep.subr.bf16.mxu0 %v4570_v52  ;;  %3680 = vmatprep.subr.bf16.mxu1 %v4681_v39  ;;  %v1319_v7 = vand.u32 4294901760, %v1265_v61 }
  0xba   :  { %3682 = vmatpush3.bf16.msra.mxu1 %v4681_v39 }
  0xbb   :  { %3261 = vmatmul.mubr.f32.gmra.mrb[6].mxu0 %v4328_v4  ;;  %v1316_v4 = vand.u32 4294901760, %v1264_v58  ;;  %3684 = vmatprep.subr.bf16.mxu1 %v4693_v57 }
  0xbc   :  { %3263 = vmatprep.mubr.f32.mxu0 %v4333_v8  ;;  %3834 = vmatpush3.bf16.msra.mxu0 %v4570_v52 }
  0xbd   :  { %3836 = vmatprep.subr.bf16.mxu0 %v4669_v27  ;;  %v4705_v8 = vpack.c.bf16 %v1319_v7, %v1316_v4  ;;  %v4770_v29 = vsub.f32 %v1264_v58, %v1316_v4 }
  0xbe   :  { %3686 = vmatpush3.bf16.msra.mxu1 %v4693_v57 }
  0xbf   :  { %3264 = vmatmul.mubr.f32.gmra.mrb[8].mxu0 %v4350_v23  ;;  %5390 = vst [vmem:[#allocation6_spill] sm:$0xff] %v4705_v8  ;;  %3688 = vmatprep.subr.bf16.mxu1 %v4705_v8  ;;  %v4714_v23 = vsub.f32 %v4487_v11, %v5391_v22  ;;  %v1588_v11 = vsub.f32 %v4744_v56, %v5350_v13  ;;  %5401 = vst [vmem:[#allocation15_spill] sm:$0xff] %v4770_v29  ;;  %v5346_v46 = vand.u32 4294901760, %v4770_v29 }
  0xc0   :  { %3266 = vmatprep.mubr.f32.mxu0 %v4378_v50  ;;  %3838 = vmatpush3.bf16.msra.mxu0 %v4669_v27  ;;  %v1525_v50 = vsub.f32 %v4719_v2, %v5360_v36 }
  0xc1   :  { %3840 = vmatprep.subr.bf16.mxu0 %v4681_v39  ;;  %5392 = vst [vmem:[#allocation7_spill] sm:$0xff] %v4714_v23  ;;  %v5362_v34 = vand.u32 4294901760, %v4714_v23  ;;  %v1589_v32 = vand.u32 4294901760, %v1588_v11  ;;  %v1616_v22 = vsub.f32 %v4770_v29, %v5346_v46  ;;  %v4790_v30 = vpack.c.bf16 %v4719_v2, %v4714_v23 }
  0xc2   :  { %3690 = vmatpush3.bf16.msra.mxu1 %v4705_v8  ;;  %v1526_v63 = vand.u32 4294901760, %v1525_v50 }
  0xc3   :  { %3267 = vmatmul.mubr.f32.gmra.mrb[10].mxu0 %v4380_v51  ;;  %v1518_v43 = vsub.f32 %v4714_v23, %v5362_v34 }
  0xc4   :  { %3269 = vmatprep.mubr.f32.mxu0 %v4411_v42  ;;  %3842 = vmatpush3.bf16.msra.mxu0 %v4681_v39  ;;  %v5352_v42 = vand.u32 4294901760, %v4732_v40 }
  0xc5   :  { %3844 = vmatprep.subr.bf16.mxu0 %v4693_v57  ;;  %v1519_v51 = vand.u32 4294901760, %v1518_v43  ;;  %v4794_v43 = vpack.c.bf16 %v4734_v41, %v4732_v40 }
  0xc6   :  { %v1574_v55 = vsub.f32 %v4732_v40, %v5352_v42 }
  0xc7   :  { %3270 = vmatmul.mubr.f32.gmra.mrb[12].mxu0 %v4413_v45  ;;  %v4729_v0 = vpack.c.bf16 %v1526_v63, %v1519_v51  ;;  %v5351_v45 = vand.u32 4294901760, %v4734_v41  ;;  %v4802_v51 = vpack.c.bf16 %v4757_v24, %v4755_v31 }
  0xc8   :  { %3272 = vmatprep.mubr.f32.mxu0 %v4426_v59  ;;  %3846 = vmatpush3.bf16.msra.mxu0 %v4693_v57  ;;  %v1575_v3 = vand.u32 4294901760, %v1574_v55  ;;  %v4811_v55 = vld [vmem:[%s5331_s2] ss:$0 sm:$0xff] }
  0xc9   :  { %3848 = vmatprep.subr.bf16.mxu0 %v4705_v8  ;;  %3692 = vmatprep.subr.bf16.mxu1 %v4729_v0  ;;  %v1581_v59 = vsub.f32 %v4734_v41, %v5351_v45 }
  0xcb   :  { %3273 = vmatmul.mubr.f32.gmra.mrb[14].mxu0 %v4431_v62  ;;  %v4746_v62 = vsub.f32 %v1261_v35, %v1307_v38  ;;  %v1582_v12 = vand.u32 4294901760, %v1581_v59  ;;  %v4772_v35 = vsub.f32 %v1265_v61, %v1319_v7  ;;  %v1603_v38 = vand.u32 4294901760, %v1602_v16 }
  0xcc   :  { %3850 = vmatpush3.bf16.msra.mxu0 %v4705_v8  ;;  %v1617_v61 = vand.u32 4294901760, %v1616_v22  ;;  %v4829_v22 = vsub.f32 %v4512_v26, %v1286_v19 }
  0xcd   :  { %5398 = vst [vmem:[#allocation12_spill] sm:$0xff] %v4746_v62  ;;  %v5349_v10 = vand.u32 4294901760, %v4746_v62  ;;  %v4750_v18 = vpack.c.bf16 %v1582_v12, %v1575_v3  ;;  %5402 = vst [vmem:[#allocation16_spill] sm:$0xff] %v4772_v35  ;;  %v5345_v47 = vand.u32 4294901760, %v4772_v35  ;;  %v4778_v48 = vpack.c.bf16 %v1610_v44, %v1603_v38 }
  0xce   :  { %v4798_v50 = vpack.c.bf16 %v4746_v62, %v4744_v56  ;;  %v4806_v63 = vpack.c.bf16 %v4772_v35, %v4770_v29  ;;  %v5354_v26 = vand.u32 4294901760, %v4829_v22 }
  0xcf   :  { %v1595_v25 = vsub.f32 %v4746_v62, %v5349_v10  ;;  %v1623_v58 = vsub.f32 %v4772_v35, %v5345_v47 }
  0xd1   :  { %v1596_v15 = vand.u32 4294901760, %v1595_v25  ;;  %v1624_v4 = vand.u32 4294901760, %v1623_v58  ;;  %v5403_v25 = vand.u32 4294901760, %v4497_v60 }
  0xd3   :  { %v4774_v37 = vpack.c.bf16 %v1596_v15, %v1589_v32  ;;  %v4786_v7 = vpack.c.bf16 %v1624_v4, %v1617_v61  ;;  %v4818_v32 = vsub.f32 %v4497_v60, %v5403_v25  ;;  %v5404_v15 = vand.u32 4294901760, %v4505_v49 }
  0xd4   :  { %v4835_v60 = vsub.f32 %v4517_v28, %v1289_v53  ;;  %v4852_v25 = vsub.f32 %v4542_v5, %v1292_v54 }
  0xd5   :  { %v4823_v16 = vsub.f32 %v4505_v49, %v5404_v15  ;;  %v5358_v49 = vand.u32 4294901760, %v4818_v32 }
  0xd7   :  { %v5357_v61 = vand.u32 4294901760, %v4823_v16  ;;  %v1532_v28 = vsub.f32 %v4818_v32, %v5358_v49 }
  0xd9   :  { %v1539_v53 = vsub.f32 %v4823_v16, %v5357_v61 }
 0x182   :  { %v3253_v59 = vpop.f32.mrb[0].mxu0 }
 0x183   :  { %v3867_v3 = vadd.f32 %v3253_v59, %v4811_v55  ;;  %v1140_v12 = vpop.f32.mrb[1].mxu0 }
 0x184   :  { %v3868_v11 = vadd.f32 %v4811_v55, %v1140_v12  ;;  %v5353_v12 = vand.u32 4294901760, %v4835_v60 }
 0x185   :  { %4061 = vtanh.f32 %v3867_v3 }
 0x186   :  { %4063 = vtanh.f32 %v3868_v11  ;;  %v3256_v20 = vpop.f32.mrb[2].mxu0  ;;  %v1553_v5 = vsub.f32 %v4835_v60, %v5353_v12 }
 0x187   :  { %v3869_v38 = vadd.f32 %v3256_v20, %v4811_v55  ;;  %v1152_v44 = vpop.f32.mrb[3].mxu0 }
 0x188   :  { %v3870_v58 = vadd.f32 %v4811_v55, %v1152_v44  ;;  %v1546_v44 = vsub.f32 %v4829_v22, %v5354_v26  ;;  %v1554_v13 = vand.u32 4294901760, %v1553_v5 }
 0x189   :  { %4065 = vtanh.f32 %v3869_v38 }
 0x18a   :  { %4067 = vtanh.f32 %v3870_v58  ;;  %v3259_v4 = vpop.f32.mrb[4].mxu0  ;;  %v4861_v58 = vsub.f32 %v4547_v1, %v1295_v17  ;;  %v5355_v17 = vand.u32 4294901760, %v4852_v25 }
 0x18b   :  { %v3871_v59 = vadd.f32 %v3259_v4, %v4811_v55  ;;  %v1164_v3 = vpop.f32.mrb[5].mxu0 }
 0x18c   :  { %v3872_v19 = vadd.f32 %v4811_v55, %v1164_v3  ;;  %v1560_v5 = vsub.f32 %v4852_v25, %v5355_v17 }
 0x18d   :  { %4069 = vtanh.f32 %v3871_v59 }
 0x18e   :  { %4071 = vtanh.f32 %v3872_v19  ;;  %v3262_v11 = vpop.f32.mrb[6].mxu0  ;;  %v1533_v19 = vand.u32 4294901760, %v1532_v28  ;;  %v5361_v28 = vand.u32 4294901760, %v4861_v58 }
 0x18f   :  { %v4062_v15 = vpop.eup %4061  ;;  %v3873_v20 = vadd.f32 %v3262_v11, %v4811_v55  ;;  %v1176_v38 = vpop.f32.mrb[7].mxu0  ;;  %v1540_v11 = vand.u32 4294901760, %v1539_v53 }
 0x190   :  { %v4064_v4 = vpop.eup %4063  ;;  %v3874_v59 = vadd.f32 %v4811_v55, %v1176_v38  ;;  %v4864_v3 = vand.u32 4294901760, %v4062_v15 }
 0x191   :  { %4073 = vtanh.f32 %v3873_v20  ;;  %v4869_v54 = vand.u32 4294901760, %v4064_v4  ;;  %v1547_v20 = vand.u32 4294901760, %v1546_v44 }
 0x192   :  { %4075 = vtanh.f32 %v3874_v59  ;;  %v3265_v47 = vpop.f32.mrb[8].mxu0  ;;  %v4872_v46 = vsub.f32 %v4062_v15, %v4864_v3 }
 0x193   :  { %v4066_v1 = vpop.eup %4065  ;;  %v3875_v38 = vadd.f32 %v3265_v47, %v4811_v55  ;;  %v1188_v14 = vpop.f32.mrb[9].mxu0  ;;  %3587 = vmatprep.mubr.f32.mxu0 %v4869_v54  ;;  %v4878_v33 = vsub.f32 %v4064_v4, %v4869_v54  ;;  %v4889_v4 = vpack.c.bf16 %v1540_v11, %v1533_v19  ;;  %v4916_v61 = vpack.c.bf16 %v1554_v13, %v1547_v20 }
 0x194   :  { %v4068_v53 = vpop.eup %4067  ;;  %v3876_v59 = vadd.f32 %v4811_v55, %v1188_v14  ;;  %3588 = vmatmul.mubr.f32.vlgmr.msra.gmra.mrb[16].mxu0 %v4864_v3  ;;  %v4883_v15 = vand.u32 4294901760, %v4066_v1  ;;  %v5356_v10 = vand.u32 4294901760, %v4872_v46 }
 0x195   :  { %4077 = vtanh.f32 %v3875_v38  ;;  %v4886_v47 = vand.u32 4294901760, %v4068_v53  ;;  %v5359_v45 = vand.u32 4294901760, %v4878_v33 }
 0x196   :  { %4079 = vtanh.f32 %v3876_v59  ;;  %v3268_v44 = vpop.f32.mrb[10].mxu0  ;;  %v1367_v14 = vsub.f32 %v4872_v46, %v5356_v10  ;;  %v4895_v42 = vsub.f32 %v4066_v1, %v4883_v15  ;;  %v1567_v1 = vsub.f32 %v4861_v58, %v5361_v28 }
 0x197   :  { %v4070_v38 = vpop.eup %4069  ;;  %v3877_v12 = vadd.f32 %v3268_v44, %v4811_v55  ;;  %v1200_v26 = vpop.f32.mrb[11].mxu0  ;;  %3590 = vmatprep.mubr.f32.mxu0 %v4886_v47  ;;  %v1357_v19 = vsub.f32 %v4878_v33, %v5359_v45  ;;  %v4906_v11 = vsub.f32 %v4068_v53, %v4886_v47 }
 0x198   :  { %v4072_v59 = vpop.eup %4071  ;;  %v3878_v17 = vadd.f32 %v4811_v55, %v1200_v26  ;;  %3591 = vmatmul.mubr.f32.gmra.mrb[18].mxu0 %v4883_v15  ;;  %v4913_v44 = vand.u32 4294901760, %v4070_v38  ;;  %v5364_v10 = vand.u32 4294901760, %v4895_v42  ;;  %v1368_v28 = vand.u32 4294901760, %v1367_v14 }
 0x199   :  { %4081 = vtanh.f32 %v3877_v12  ;;  %v1358_v49 = vand.u32 4294901760, %v1357_v19  ;;  %v4918_v45 = vand.u32 4294901760, %v4072_v59  ;;  %v5366_v53 = vand.u32 4294901760, %v4906_v11 }
 0x19a   :  { %4083 = vtanh.f32 %v3878_v17  ;;  %v3271_v36 = vpop.f32.mrb[12].mxu0  ;;  %v1387_v26 = vsub.f32 %v4895_v42, %v5364_v10  ;;  %v4925_v34 = vsub.f32 %v4070_v38, %v4913_v44  ;;  %v1561_v14 = vand.u32 4294901760, %v1560_v5 }
 0x19b   :  { %v4074_v35 = vpop.eup %4073  ;;  %v3879_v13 = vadd.f32 %v3271_v36, %v4811_v55  ;;  %v1212_v20 = vpop.f32.mrb[13].mxu0  ;;  %3307 = vmatprep.mubr.f32.mxu1 %v1358_v49  ;;  %3593 = vmatprep.mubr.f32.mxu0 %v4918_v45  ;;  %v1377_v12 = vsub.f32 %v4906_v11, %v5366_v53  ;;  %v4933_v17 = vsub.f32 %v4072_v59, %v4918_v45  ;;  %v1568_v49 = vand.u32 4294901760, %v1567_v1 }
 0x19c   :  { %v4076_v19 = vpop.eup %4075  ;;  %v4935_v10 = vand.u32 4294901760, %v4074_v35  ;;  %v3880_v38 = vadd.f32 %v4811_v55, %v1212_v20  ;;  %3308 = vmatmul.mubr.f32.vlgmr.msra.gmra.mrb[0].mxu1 %v1368_v28  ;;  %3594 = vmatmul.mubr.f32.gmra.mrb[20].mxu0 %v4913_v44  ;;  %v5369_v36 = vand.u32 4294901760, %v4925_v34  ;;  %v1388_v24 = vand.u32 4294901760, %v1387_v26 }
 0x19d   :  { %v4940_v29 = vand.u32 4294901760, %v4076_v19  ;;  %4085 = vtanh.f32 %v3879_v13  ;;  %3694 = vmatpush3.bf16.msra.mxu1 %v4729_v0  ;;  %v1378_v53 = vand.u32 4294901760, %v1377_v12  ;;  %v5374_v59 = vand.u32 4294901760, %v4933_v17 }
 0x19e   :  { %4087 = vtanh.f32 %v3880_v38  ;;  %v3274_v5 = vpop.f32.mrb[14].mxu0  ;;  %3696 = vmatprep.subr.bf16.mxu1 %v4889_v4  ;;  %v1407_v28 = vsub.f32 %v4925_v34, %v5369_v36  ;;  %v4949_v20 = vsub.f32 %v4074_v35, %v4935_v10  ;;  %v3703_v62 = vpack.c.bf16 %v1568_v49, %v1561_v14 }
 0x19f   :  { %v4078_v1 = vpop.eup %4077  ;;  %v3881_v13 = vadd.f32 %v3274_v5, %v4811_v55  ;;  %v1224_v31 = vpop.f32.mrb[15].mxu0  ;;  %3310 = vmatprep.mubr.f32.mxu1 %v1378_v53  ;;  %v1397_v0 = vsub.f32 %v4933_v17, %v5374_v59  ;;  %v4956_v26 = vsub.f32 %v4076_v19, %v4940_v29 }
 0x1a0   :  { %v4080_v12 = vpop.eup %4079  ;;  %v4958_v38 = vand.u32 4294901760, %v4078_v1  ;;  %v3882_v36 = vadd.f32 %v4811_v55, %v1224_v31  ;;  %3311 = vmatmul.mubr.f32.gmra.mrb[2].mxu1 %v1388_v24  ;;  %v5372_v35 = vand.u32 4294901760, %v4949_v20  ;;  %v1408_v19 = vand.u32 4294901760, %v1407_v28 }
 0x1a1   :  { %v4962_v56 = vand.u32 4294901760, %v4080_v12  ;;  %4089 = vtanh.f32 %v3881_v13  ;;  %3698 = vmatpush3.bf16.msra.mxu1 %v4889_v4  ;;  %v1398_v53 = vand.u32 4294901760, %v1397_v0  ;;  %v5373_v5 = vand.u32 4294901760, %v4956_v26 }
 0x1a2   :  { %4091 = vtanh.f32 %v3882_v36  ;;  %3700 = vmatprep.subr.bf16.mxu1 %v4916_v61  ;;  %v1427_v31 = vsub.f32 %v4949_v20, %v5372_v35  ;;  %v4971_v24 = vsub.f32 %v4078_v1, %v4958_v38 }
 0x1a3   :  { %v4082_v55 = vpop.eup %4081  ;;  %3313 = vmatprep.mubr.f32.mxu1 %v1398_v53  ;;  %v1417_v4 = vsub.f32 %v4956_v26, %v5373_v5  ;;  %v4977_v14 = vsub.f32 %v4080_v12, %v4962_v56 }
 0x1a4   :  { %v4084_v36 = vpop.eup %4083  ;;  %v4979_v49 = vand.u32 4294901760, %v4082_v55  ;;  %3314 = vmatmul.mubr.f32.gmra.mrb[4].mxu1 %v1408_v19  ;;  %v5376_v28 = vand.u32 4294901760, %v4971_v24  ;;  %v1428_v53 = vand.u32 4294901760, %v1427_v31 }
 0x1a5   :  { %v4982_v13 = vand.u32 4294901760, %v4084_v36  ;;  %3702 = vmatpush3.bf16.msra.mxu1 %v4916_v61  ;;  %v1418_v1 = vand.u32 4294901760, %v1417_v4  ;;  %v5377_v0 = vand.u32 4294901760, %v4977_v14 }
 0x1a6   :  { %3704 = vmatprep.subr.bf16.mxu1 %v3703_v62  ;;  %v1447_v12 = vsub.f32 %v4971_v24, %v5376_v28  ;;  %v4990_v35 = vsub.f32 %v4082_v55, %v4979_v49 }
 0x1a7   :  { %v4086_v5 = vpop.eup %4085  ;;  %3316 = vmatprep.mubr.f32.mxu1 %v1418_v1  ;;  %v1437_v19 = vsub.f32 %v4977_v14, %v5377_v0  ;;  %v4996_v61 = vsub.f32 %v4084_v36, %v4982_v13 }
 0x1a8   :  { %v4088_v4 = vpop.eup %4087  ;;  %v4998_v59 = vand.u32 4294901760, %v4086_v5  ;;  %3317 = vmatmul.mubr.f32.gmra.mrb[6].mxu1 %v1428_v53  ;;  %v5381_v31 = vand.u32 4294901760, %v4990_v35  ;;  %v1448_v1 = vand.u32 4294901760, %v1447_v12 }
 0x1a9   :  { %v5001_v41 = vand.u32 4294901760, %v4088_v4  ;;  %3706 = vmatpush3.bf16.msra.mxu1 %v3703_v62  ;;  %v1438_v55 = vand.u32 4294901760, %v1437_v19  ;;  %v5382_v28 = vand.u32 4294901760, %v4996_v61 }
 0x1aa   :  { %3708 = vmatprep.subr.bf16.mxu1 %v4750_v18  ;;  %v1467_v36 = vsub.f32 %v4990_v35, %v5381_v31  ;;  %v5009_v0 = vsub.f32 %v4086_v5, %v4998_v59 }
 0x1ab   :  { %v4090_v40 = vpop.eup %4089  ;;  %3319 = vmatprep.mubr.f32.mxu1 %v1438_v55  ;;  %v1457_v53 = vsub.f32 %v4996_v61, %v5382_v28  ;;  %v5015_v62 = vsub.f32 %v4088_v4, %v5001_v41 }
 0x1ac   :  { %v4092_v19 = vpop.eup %4091  ;;  %v5017_v12 = vand.u32 4294901760, %v4090_v40  ;;  %3320 = vmatmul.mubr.f32.gmra.mrb[8].mxu1 %v1448_v1  ;;  %v5385_v2 = vand.u32 4294901760, %v5009_v0  ;;  %v1468_v31 = vand.u32 4294901760, %v1467_v36 }
 0x1ad   :  { %v5020_v23 = vand.u32 4294901760, %v4092_v19  ;;  %3710 = vmatpush3.bf16.msra.mxu1 %v4750_v18  ;;  %v1458_v5 = vand.u32 4294901760, %v1457_v53  ;;  %v1476_v55 = vand.u32 4294901760, %v5015_v62 }
 0x1ae   :  { %3712 = vmatprep.subr.bf16.mxu1 %v4774_v37  ;;  %v1487_v4 = vsub.f32 %v5009_v0, %v5385_v2  ;;  %v5029_v28 = vsub.f32 %v4090_v40, %v5017_v12 }
 0x1af   :  { %3322 = vmatprep.mubr.f32.mxu1 %v1458_v5  ;;  %v1477_v1 = vsub.f32 %v5015_v62, %v1476_v55  ;;  %v5035_v18 = vsub.f32 %v4092_v19, %v5020_v23  ;;  %v3727_v5 = vpack.c.bf16 %v4823_v16, %v4818_v32 }
 0x1b0   :  { %3323 = vmatmul.mubr.f32.gmra.mrb[10].mxu1 %v1468_v31  ;;  %v1506_v36 = vand.u32 4294901760, %v5029_v28  ;;  %v1488_v2 = vand.u32 4294901760, %v1487_v4  ;;  %v5410_v4 = vand.u32 4294901760, %v4878_v33 }
 0x1b1   :  { %3714 = vmatpush3.bf16.msra.mxu1 %v4774_v37  ;;  %v1478_v53 = vand.u32 4294901760, %v1477_v1  ;;  %v1496_v8 = vand.u32 4294901760, %v5035_v18  ;;  %v5411_v1 = vand.u32 4294901760, %v4818_v32  ;;  %v5418_v32 = vand.u32 4294901760, %v4933_v17 }
 0x1b2   :  { %3716 = vmatprep.subr.bf16.mxu1 %v4778_v48  ;;  %v1507_v40 = vsub.f32 %v5029_v28, %v1506_v36 }
 0x1b3   :  { %3325 = vmatprep.mubr.f32.mxu1 %v1478_v53  ;;  %v1497_v19 = vsub.f32 %v5035_v18, %v1496_v8  ;;  %v5412_v53 = vand.u32 4294901760, %v4823_v16  ;;  %v5420_v16 = vand.u32 4294901760, %v4861_v58 }
 0x1b4   :  { %3326 = vmatmul.mubr.f32.gmra.mrb[12].mxu1 %v1488_v2  ;;  %v1508_v37 = vand.u32 4294901760, %v1507_v40  ;;  %v3731_v2 = vpack.c.bf16 %v4835_v60, %v4829_v22 }
 0x1b5   :  { %3718 = vmatpush3.bf16.msra.mxu1 %v4778_v48  ;;  %v1498_v31 = vand.u32 4294901760, %v1497_v19  ;;  %v3735_v48 = vpack.c.bf16 %v4861_v58, %v4852_v25  ;;  %v3791_v40 = vpack.c.bf16 %v5412_v53, %v5411_v1  ;;  %v5413_v19 = vand.u32 4294901760, %v4872_v46 }
 0x1b6   :  { %3720 = vmatprep.subr.bf16.mxu1 %v4786_v7  ;;  %v5434_v1 = vand.u32 4294901760, %v4996_v61 }
 0x1b7   :  { %3328 = vmatprep.mubr.f32.mxu1 %v1498_v31  ;;  %v5414_v31 = vand.u32 4294901760, %v4906_v11 }
 0x1b8   :  { %3329 = vmatmul.mubr.f32.gmra.mrb[14].mxu1 %v1508_v37  ;;  %v5415_v37 = vand.u32 4294901760, %v4829_v22  ;;  %v5422_v22 = vand.u32 4294901760, %v4956_v26 }
 0x1b9   :  { %3722 = vmatpush3.bf16.msra.mxu1 %v4786_v7  ;;  %3363 = vmatprep.mubr.f32.mxu1 %v4869_v54  ;;  %v5405_v7 = vld [vmem:[#allocation6_spill] sm:$0xff] }
 0x1ba   :  { %3724 = vmatprep.subr.bf16.mxu1 %v4790_v30 }
 0x1bc   :  { %3364 = vmatmul.mubr.f32.vlgmr.msra.gmra.mrb[0].mxu1 %v4864_v3 }
 0x1bd   :  { %3366 = vmatprep.mubr.f32.mxu1 %v4886_v47  ;;  %3726 = vmatpush3.bf16.msra.mxu1 %v4790_v30  ;;  %v5406_v30 = vld [vmem:[#allocation7_spill] sm:$0xff] }
 0x1be   :  { %3728 = vmatprep.subr.bf16.mxu1 %v3727_v5 }
 0x1c0   :  { %3367 = vmatmul.mubr.f32.gmra.mrb[2].mxu1 %v4883_v15 }
 0x1c1   :  { %3369 = vmatprep.mubr.f32.mxu1 %v4918_v45  ;;  %3730 = vmatpush3.bf16.msra.mxu1 %v3727_v5  ;;  %v5416_v5 = vand.u32 4294901760, %v4835_v60 }
 0x1c2   :  { %3732 = vmatprep.subr.bf16.mxu1 %v3731_v2 }
 0x1c4   :  { %3370 = vmatmul.mubr.f32.gmra.mrb[4].mxu1 %v4913_v44 }
 0x1c5   :  { %3372 = vmatprep.mubr.f32.mxu1 %v4940_v29  ;;  %3734 = vmatpush3.bf16.msra.mxu1 %v3731_v2  ;;  %v5417_v2 = vand.u32 4294901760, %v4895_v42 }
 0x1c6   :  { %3736 = vmatprep.subr.bf16.mxu1 %v3735_v48 }
 0x1c8   :  { %3373 = vmatmul.mubr.f32.gmra.mrb[6].mxu1 %v4935_v10 }
 0x1c9   :  { %3375 = vmatprep.mubr.f32.mxu1 %v4962_v56  ;;  %3738 = vmatpush3.bf16.msra.mxu1 %v3735_v48  ;;  %v5421_v48 = vand.u32 4294901760, %v4925_v34 }
 0x1ca   :  { %3740 = vmatprep.subr.bf16.mxu1 %v4794_v43 }
 0x1cc   :  { %3376 = vmatmul.mubr.f32.gmra.mrb[8].mxu1 %v4958_v38 }
 0x1cd   :  { %3378 = vmatprep.mubr.f32.mxu1 %v4982_v13  ;;  %3742 = vmatpush3.bf16.msra.mxu1 %v4794_v43  ;;  %v5407_v43 = vand.u32 4294901760, %v5406_v30  ;;  %v5425_v30 = vld [vmem:[#allocation10_spill] sm:$0xff] }
 0x1ce   :  { %3744 = vmatprep.subr.bf16.mxu1 %v4798_v50 }
 0x1d0   :  { %3379 = vmatmul.mubr.f32.gmra.mrb[10].mxu1 %v4979_v49 }
 0x1d1   :  { %3381 = vmatprep.mubr.f32.mxu1 %v5001_v41  ;;  %3746 = vmatpush3.bf16.msra.mxu1 %v4798_v50  ;;  %v5408_v50 = vld [vmem:[#allocation8_spill] sm:$0xff] }
 0x1d2   :  { %3748 = vmatprep.subr.bf16.mxu1 %v4802_v51 }
 0x1d4   :  { %3382 = vmatmul.mubr.f32.gmra.mrb[12].mxu1 %v4998_v59 }
 0x1d5   :  { %3384 = vmatprep.mubr.f32.mxu1 %v5020_v23  ;;  %3750 = vmatpush3.bf16.msra.mxu1 %v4802_v51  ;;  %v5409_v51 = vand.u32 4294901760, %v5408_v50  ;;  %v5427_v50 = vand.u32 4294901760, %v4949_v20 }
 0x1d6   :  { %3752 = vmatprep.subr.bf16.mxu1 %v4806_v63 }
 0x1d8   :  { %3385 = vmatmul.mubr.f32.gmra.mrb[14].mxu1 %v5017_v12 }
 0x1d9   :  { %3754 = vmatpush3.bf16.msra.mxu1 %v4806_v63  ;;  %3419 = vmatprep.mubr.f32.mxu1 %v4878_v33  ;;  %v3787_v63 = vpack.c.bf16 %v5409_v51, %v5407_v43  ;;  %v3795_v33 = vpack.c.bf16 %v5416_v5, %v5415_v37  ;;  %v5431_v51 = vld [vmem:[#allocation12_spill] sm:$0xff] }
 0x1da   :  { %3756 = vmatprep.subr.bf16.mxu1 %v4524_v6  ;;  %v5442_v5 = vld [vmem:[#allocation16_spill] sm:$0xff] }
 0x1dc   :  { %3420 = vmatmul.mubr.f32.vlgmr.msra.gmra.mrb[0].mxu1 %v4872_v46  ;;  %v5419_v46 = vand.u32 4294901760, %v4852_v25  ;;  %v5428_v25 = vand.u32 4294901760, %v4977_v14 }
 0x1dd   :  { %3422 = vmatprep.mubr.f32.mxu1 %v4906_v11  ;;  %3758 = vmatpush3.bf16.msra.mxu1 %v4524_v6 }
 0x1de   :  { %3760 = vmatprep.subr.bf16.mxu1 %v4533_v9  ;;  %v3799_v11 = vpack.c.bf16 %v5420_v16, %v5419_v46 }
 0x1e0   :  { %3423 = vmatmul.mubr.f32.gmra.mrb[2].mxu1 %v4895_v42  ;;  %v5423_v42 = vld [vmem:[#allocation9_spill] sm:$0xff] }
 0x1e1   :  { %3425 = vmatprep.mubr.f32.mxu1 %v4933_v17  ;;  %3762 = vmatpush3.bf16.msra.mxu1 %v4533_v9  ;;  %v5424_v60 = vand.u32 4294901760, %v5423_v42  ;;  %v5426_v17 = vand.u32 4294901760, %v5425_v30 }
 0x1e2   :  { %3764 = vmatprep.subr.bf16.mxu1 %v4558_v21 }
 0x1e3   :  { %v3803_v43 = vpack.c.bf16 %v5426_v17, %v5424_v60 }
 0x1e4   :  { %3426 = vmatmul.mubr.f32.gmra.mrb[4].mxu1 %v4925_v34  ;;  %v5429_v34 = vld [vmem:[#allocation11_spill] sm:$0xff] }
 0x1e5   :  { %3428 = vmatprep.mubr.f32.mxu1 %v4956_v26  ;;  %3766 = vmatpush3.bf16.msra.mxu1 %v4558_v21  ;;  %v5430_v58 = vand.u32 4294901760, %v5429_v34  ;;  %v5432_v26 = vand.u32 4294901760, %v5431_v51 }
 0x1e6   :  { %3768 = vmatprep.subr.bf16.mxu1 %v4570_v52 }
 0x1e8   :  { %3429 = vmatmul.mubr.f32.gmra.mrb[6].mxu1 %v4949_v20  ;;  %v5435_v20 = vld [vmem:[#allocation13_spill] sm:$0xff] }
 0x1e9   :  { %3431 = vmatprep.mubr.f32.mxu1 %v4977_v14  ;;  %3770 = vmatpush3.bf16.msra.mxu1 %v4570_v52  ;;  %v5436_v53 = vand.u32 4294901760, %v5435_v20 }
 0x1ea   :  { %3772 = vmatprep.subr.bf16.mxu1 %v4669_v27 }
 0x1ec   :  { %3432 = vmatmul.mubr.f32.gmra.mrb[8].mxu1 %v4971_v24 }
 0x1ed   :  { %3434 = vmatprep.mubr.f32.mxu1 %v4996_v61  ;;  %3774 = vmatpush3.bf16.msra.mxu1 %v4669_v27  ;;  %v5443_v61 = vand.u32 4294901760, %v5442_v5 }
 0x1ee   :  { %3776 = vmatprep.subr.bf16.mxu1 %v4681_v39 }
 0x1f0   :  { %3435 = vmatmul.mubr.f32.gmra.mrb[10].mxu1 %v4990_v35 }
 0x1f1   :  { %3437 = vmatprep.mubr.f32.mxu1 %v5015_v62  ;;  %3778 = vmatpush3.bf16.msra.mxu1 %v4681_v39 }
 0x1f2   :  { %3780 = vmatprep.subr.bf16.mxu1 %v4693_v57 }
 0x1f4   :  { %3438 = vmatmul.mubr.f32.gmra.mrb[12].mxu1 %v5009_v0 }
 0x1f5   :  { %3440 = vmatprep.mubr.f32.mxu1 %v5035_v18  ;;  %3782 = vmatpush3.bf16.msra.mxu1 %v4693_v57 }
 0x1f6   :  { %3784 = vmatprep.subr.bf16.mxu1 %v5405_v7 }
 0x1f8   :  { %3441 = vmatmul.mubr.f32.gmra.mrb[14].mxu1 %v5029_v28 }
 0x1f9   :  { %3786 = vmatpush3.bf16.msra.mxu1 %v5405_v7  ;;  %3475 = vmatprep.mubr.f32.mxu1 %v5410_v4  ;;  %v5433_v4 = vand.u32 4294901760, %v4971_v24  ;;  %v5440_v24 = vld [vmem:[#allocation15_spill] sm:$0xff] }
 0x1fa   :  { %3788 = vmatprep.subr.bf16.mxu1 %v3787_v63  ;;  %v5441_v37 = vand.u32 4294901760, %v5440_v24 }
 0x1fc   :  { %3476 = vmatmul.mubr.f32.vlgmr.msra.gmra.mrb[0].mxu1 %v5413_v19 }
 0x1fd   :  { %3478 = vmatprep.mubr.f32.mxu1 %v5414_v31  ;;  %3790 = vmatpush3.bf16.msra.mxu1 %v3787_v63  ;;  %v3807_v63 = vpack.c.bf16 %v5432_v26, %v5430_v58  ;;  %v5439_v31 = vand.u32 4294901760, %v4990_v35 }
 0x1fe   :  { %3792 = vmatprep.subr.bf16.mxu1 %v3791_v40 }
 0x200   :  { %3479 = vmatmul.mubr.f32.gmra.mrb[2].mxu1 %v5417_v2  ;;  %v5444_v2 = vand.u32 4294901760, %v5009_v0  ;;  %v5234_v0 = vld [vmem:[%s5334_s5] ss:$0 sm:$0xff] }
 0x201   :  { %3481 = vmatprep.mubr.f32.mxu1 %v5418_v32  ;;  %3794 = vmatpush3.bf16.msra.mxu1 %v3791_v40  ;;  %v5437_v40 = vld [vmem:[#allocation14_spill] sm:$0xff] }
 0x202   :  { %3796 = vmatprep.subr.bf16.mxu1 %v3795_v33  ;;  %v5438_v14 = vand.u32 4294901760, %v5437_v40 }
 0x204   :  { %3482 = vmatmul.mubr.f32.gmra.mrb[4].mxu1 %v5421_v48  ;;  %v3811_v19 = vpack.c.bf16 %v5438_v14, %v5436_v53 }
 0x205   :  { %3484 = vmatprep.mubr.f32.mxu1 %v5422_v22  ;;  %3798 = vmatpush3.bf16.msra.mxu1 %v3795_v33  ;;  %v3815_v33 = vpack.c.bf16 %v5443_v61, %v5441_v37 }
 0x206   :  { %3800 = vmatprep.subr.bf16.mxu1 %v3799_v11 }
 0x208   :  { %3485 = vmatmul.mubr.f32.gmra.mrb[6].mxu1 %v5427_v50 }
 0x209   :  { %3487 = vmatprep.mubr.f32.mxu1 %v5428_v25  ;;  %3802 = vmatpush3.bf16.msra.mxu1 %v3799_v11 }
 0x20a   :  { %3804 = vmatprep.subr.bf16.mxu1 %v3803_v43 }
 0x20c   :  { %3488 = vmatmul.mubr.f32.gmra.mrb[8].mxu1 %v5433_v4 }
 0x20d   :  { %3490 = vmatprep.mubr.f32.mxu1 %v5434_v1  ;;  %3806 = vmatpush3.bf16.msra.mxu1 %v3803_v43 }
 0x20e   :  { %3808 = vmatprep.subr.bf16.mxu1 %v3807_v63 }
 0x210   :  { %3491 = vmatmul.mubr.f32.gmra.mrb[10].mxu1 %v5439_v31 }
 0x211   :  { %3493 = vmatprep.mubr.f32.mxu1 %v1476_v55  ;;  %3810 = vmatpush3.bf16.msra.mxu1 %v3807_v63 }
 0x212   :  { %3812 = vmatprep.subr.bf16.mxu1 %v3811_v19 }
 0x214   :  { %3494 = vmatmul.mubr.f32.gmra.mrb[12].mxu1 %v5444_v2 }
 0x215   :  { %3496 = vmatprep.mubr.f32.mxu1 %v1496_v8  ;;  %3814 = vmatpush3.bf16.msra.mxu1 %v3811_v19 }
 0x216   :  { %3816 = vmatprep.subr.bf16.mxu1 %v3815_v33 }
 0x218   :  { %3497 = vmatmul.mubr.f32.gmra.mrb[14].mxu1 %v1506_v36 }
 0x219   :  { %3818 = vmatpush3.bf16.msra.mxu1 %v3815_v33  ;;  %3531 = vmatprep.mubr.f32.mxu1 %v4869_v54 }
 0x21a   :  { %3851 = vmatprep.subr.bf16.mxu1 %v4524_v6 }
 0x21c   :  { %3532 = vmatmul.mubr.f32.vlgmr.msra.gmra.mrb[0].mxu1 %v4864_v3 }
 0x21d   :  { %3534 = vmatprep.mubr.f32.mxu1 %v4886_v47  ;;  %3859 = vmatpush3.bf16.msra.mxu1 %v4524_v6 }
 0x21e   :  { %3852 = vmatprep.subr.bf16.mxu1 %v4533_v9 }
 0x220   :  { %3535 = vmatmul.mubr.f32.gmra.mrb[2].mxu1 %v4883_v15 }
 0x221   :  { %3537 = vmatprep.mubr.f32.mxu1 %v4918_v45  ;;  %3860 = vmatpush3.bf16.msra.mxu1 %v4533_v9 }
 0x222   :  { %3853 = vmatprep.subr.bf16.mxu1 %v4558_v21 }
 0x224   :  { %3538 = vmatmul.mubr.f32.gmra.mrb[4].mxu1 %v4913_v44 }
 0x225   :  { %3540 = vmatprep.mubr.f32.mxu1 %v4940_v29  ;;  %3861 = vmatpush3.bf16.msra.mxu1 %v4558_v21 }
 0x226   :  { %3854 = vmatprep.subr.bf16.mxu1 %v4570_v52 }
 0x228   :  { %3541 = vmatmul.mubr.f32.gmra.mrb[6].mxu1 %v4935_v10 }
 0x229   :  { %3543 = vmatprep.mubr.f32.mxu1 %v4962_v56  ;;  %3862 = vmatpush3.bf16.msra.mxu1 %v4570_v52 }
 0x22a   :  { %3855 = vmatprep.subr.bf16.mxu1 %v4669_v27 }
 0x22c   :  { %3544 = vmatmul.mubr.f32.gmra.mrb[8].mxu1 %v4958_v38 }
 0x22d   :  { %3546 = vmatprep.mubr.f32.mxu1 %v4982_v13  ;;  %3863 = vmatpush3.bf16.msra.mxu1 %v4669_v27 }
 0x22e   :  { %3856 = vmatprep.subr.bf16.mxu1 %v4681_v39 }
 0x230   :  { %3547 = vmatmul.mubr.f32.gmra.mrb[10].mxu1 %v4979_v49 }
 0x231   :  { %3549 = vmatprep.mubr.f32.mxu1 %v5001_v41  ;;  %3864 = vmatpush3.bf16.msra.mxu1 %v4681_v39 }
 0x232   :  { %3857 = vmatprep.subr.bf16.mxu1 %v4693_v57 }
 0x234   :  { %3550 = vmatmul.mubr.f32.gmra.mrb[12].mxu1 %v4998_v59 }
 0x235   :  { %3552 = vmatprep.mubr.f32.mxu1 %v5020_v23  ;;  %3865 = vmatpush3.bf16.msra.mxu1 %v4693_v57  ;;  %v5223_v57 = vld [vmem:[%s5333_s4] ss:$0 sm:$0xff] }
 0x236   :  { %3858 = vmatprep.subr.bf16.mxu1 %v5405_v7 }
 0x238   :  { %3553 = vmatmul.mubr.f32.gmra.mrb[14].mxu1 %v5017_v12 }
 0x239   :  { %3866 = vmatpush3.bf16.msra.mxu1 %v5405_v7  ;;  %3596 = vmatprep.mubr.f32.mxu1 %v4940_v29 }
 0x23c   :  { %3597 = vmatmul.mubr.f32.vlgmr.msra.gmra.mrb[6].mxu1 %v4935_v10 }
 0x23d   :  { %3599 = vmatprep.mubr.f32.mxu1 %v4962_v56 }
 0x240   :  { %3600 = vmatmul.mubr.f32.gmra.mrb[8].mxu1 %v4958_v38 }
 0x241   :  { %3602 = vmatprep.mubr.f32.mxu1 %v4982_v13 }
 0x244   :  { %3603 = vmatmul.mubr.f32.gmra.mrb[10].mxu1 %v4979_v49 }
 0x245   :  { %3605 = vmatprep.mubr.f32.mxu1 %v5001_v41 }
 0x248   :  { %3606 = vmatmul.mubr.f32.gmra.mrb[12].mxu1 %v4998_v59 }
 0x249   :  { %3608 = vmatprep.mubr.f32.mxu1 %v5020_v23 }
 0x24c   :  { %3609 = vmatmul.mubr.f32.gmra.mrb[14].mxu1 %v5017_v12 }
 0x267   :  { %v3589_v52 = vpop.f32.mrb[16].mxu0 }
 0x268   :  { %v2465_v21 = vpop.f32.mrb[17].mxu0 }
 0x26b   :  { %v3592_v6 = vpop.f32.mrb[18].mxu0 }
 0x26c   :  { %v2477_v9 = vpop.f32.mrb[19].mxu0 }
 0x26f   :  { %v3595_v27 = vpop.f32.mrb[20].mxu0 }
 0x270   :  { %v2489_v39 = vpop.f32.mrb[21].mxu0 }
 0x2ef   :  { %v3533_v8 = vpop.f32.mrb[0].mxu1 }
 0x2f0   :  { %v3883_v41 = vadd.f32 %v3533_v8, %v5223_v57  ;;  %v2288_v45 = vpop.f32.mrb[1].mxu1 }
 0x2f1   :  { %v3885_v56 = vadd.f32 %v5223_v57, %v2288_v45 }
 0x2f2   :  { %v3884_v23 = vadd.f32 %v3883_v41, %v3589_v52 }
 0x2f3   :  { %v3886_v10 = vadd.f32 %v3885_v56, %v2465_v21  ;;  %v3536_v29 = vpop.f32.mrb[2].mxu1 }
 0x2f4   :  { %v3887_v3 = vadd.f32 %v3536_v29, %v5223_v57  ;;  %v2300_v54 = vpop.f32.mrb[3].mxu1 }
 0x2f5   :  { %4093 = vtanh.f32 %v3886_v10  ;;  %v3889_v15 = vadd.f32 %v5223_v57, %v2300_v54 }
 0x2f6   :  { %v3888_v47 = vadd.f32 %v3887_v3, %v3592_v6  ;;  %4095 = vtanh.f32 %v3884_v23  ;;  %v2577_v3 = vlaneseq }
 0x2f7   :  { %v3890_v44 = vadd.f32 %v3889_v15, %v2477_v9  ;;  %v3539_v59 = vpop.f32.mrb[4].mxu1 }
 0x2f8   :  { %v3891_v38 = vadd.f32 %v3539_v59, %v5223_v57  ;;  %v2312_v35 = vpop.f32.mrb[5].mxu1  ;;  %v5262_v54 = vshrl.u32 %v2577_v3, 7 }
 0x2f9   :  { %4097 = vtanh.f32 %v3890_v44  ;;  %v3893_v49 = vadd.f32 %v5223_v57, %v2312_v35  ;;  %v5265_v44 = vand.u32 127, %v2577_v3 }
 0x2fa   :  { %v3892_v28 = vadd.f32 %v3891_v38, %v3595_v27  ;;  %4099 = vtanh.f32 %v3888_v47  ;;  %v2579_v15 = vadd.s32 8, %v5262_v54  ;;  %v2580_v59 = vadd.s32 16, %v5262_v54 }
 0x2fb   :  { %v3894_v13 = vadd.f32 %v3893_v49, %v2489_v39  ;;  %vm2596_vm2 = vcmp.eq.s32.totalorder %v5262_v54, %v5265_v44  ;;  %v4149_v38 = vmov 0.0  }
 0x2fc   :  { %vm2597_vm1 = vcmp.eq.s32.totalorder %v2579_v15, %v5265_v44  ;;  %vm2598_vm3 = vcmp.eq.s32.totalorder %v2580_v59, %v5265_v44 }
 0x2fd   :  { %4101 = vtanh.f32 %v3894_v13  ;;  %v2755_v35 = vsel %vm2597_vm1, 1.0, %v4149_v38  ;;  %v2754_v13 = vsel %vm2596_vm2, 1.0, %v4149_v38 }
 0x2fe   :  { %4103 = vtanh.f32 %v3892_v28  ;;  %v2581_v28 = vadd.s32 24, %v5262_v54 }
 0x2ff   :  { %v4094_v62 = vpop.eup %4093 }
 0x300   :  { %v2650_v12 = vmul.f32 %v4094_v62, %v5234_v0  ;;  %v4096_v55 = vpop.eup %4095  ;;  %vm2599_vm4 = vcmp.eq.s32.totalorder %v2581_v28, %v5265_v44 }
 0x301   :  { %v2651_v36 = vmul.f32 %v4096_v55, %v5234_v0  ;;  %v2756_v55 = vsel %vm2598_vm3, 1.0, %v4149_v38 }
 0x302   :  { %2666 = vadd.xlane.f32.xlu0 %v2650_v12 }
 0x303   :  { %v4098_v18 = vpop.eup %4097 }
 0x304   :  { %v2652_v7 = vmul.f32 %v4098_v18, %v5234_v0  ;;  %v4100_v32 = vpop.eup %4099 }
 0x305   :  { %v2653_v16 = vmul.f32 %v4100_v32, %v5234_v0 }
 0x306   :  { %2668 = vadd.xlane.f32.xlu0 %v2651_v36  ;;  %2670 = vadd.xlane.f32.xlu1 %v2652_v7  ;;  %v2582_v36 = vadd.s32 32, %v5262_v54  ;;  %v2757_v7 = vsel %vm2599_vm4, 1.0, %v4149_v38 }
 0x307   :  { %v4102_v46 = vpop.eup %4101 }
 0x308   :  { %v2654_v11 = vmul.f32 %v4102_v46, %v5234_v0  ;;  %v4104_v48 = vpop.eup %4103  ;;  %vm2600_vm5 = vcmp.eq.s32.totalorder %v2582_v36, %v5265_v44 }
 0x309   :  { %v2655_v22 = vmul.f32 %v4104_v48, %v5234_v0 }
 0x30a   :  { %2672 = vadd.xlane.f32.xlu1 %v2653_v16  ;;  %2674 = vadd.xlane.f32.xlu0 %v2654_v11  ;;  %v2583_v16 = vadd.s32 40, %v5262_v54 }
 0x30c   :  { %vm2601_vm6 = vcmp.eq.s32.totalorder %v2583_v16, %v5265_v44 }
 0x30e   :  { %2676 = vadd.xlane.f32.xlu1 %v2655_v22  ;;  %v2584_v22 = vadd.s32 48, %v5262_v54 }
 0x30f   :  { %v3598_v42 = vpop.f32.mrb[6].mxu1 }
 0x310   :  { %v3895_v60 = vadd.f32 %v3598_v42, %v5223_v57  ;;  %v2501_v30 = vpop.f32.mrb[7].mxu1  ;;  %v2758_v42 = vsel %vm2600_vm5, 1.0, %v4149_v38  ;;  %vm2602_vm7 = vcmp.eq.s32.totalorder %v2584_v22, %v5265_v44 }
 0x311   :  { %v3896_v17 = vadd.f32 %v5223_v57, %v2501_v30 }
 0x312   :  { %4105 = vtanh.f32 %v3895_v60 }
 0x313   :  { %4107 = vtanh.f32 %v3896_v17  ;;  %v3601_v43 = vpop.f32.mrb[8].mxu1  ;;  %v2585_v17 = vadd.s32 56, %v5262_v54 }
 0x314   :  { %v3897_v50 = vadd.f32 %v3601_v43, %v5223_v57  ;;  %v2513_v25 = vpop.f32.mrb[9].mxu1  ;;  %v2759_v43 = vsel %vm2601_vm6, 1.0, %v4149_v38 }
 0x315   :  { %v3898_v34 = vadd.f32 %v5223_v57, %v2513_v25  ;;  %vm2603_vm8 = vcmp.eq.s32.totalorder %v2585_v17, %v5265_v44 }
 0x316   :  { %4109 = vtanh.f32 %v3897_v50 }
 0x317   :  { %4111 = vtanh.f32 %v3898_v34  ;;  %v3604_v58 = vpop.f32.mrb[10].mxu1  ;;  %v2586_v34 = vadd.s32 64, %v5262_v54 }
 0x318   :  { %v3899_v51 = vadd.f32 %v3604_v58, %v5223_v57  ;;  %v2525_v26 = vpop.f32.mrb[11].mxu1 }
 0x319   :  { %v3900_v63 = vadd.f32 %v5223_v57, %v2525_v26  ;;  %v2587_v26 = vadd.s32 72, %v5262_v54  ;;  %vm2604_vm9 = vcmp.eq.s32.totalorder %v2586_v34, %v5265_v44 }
 0x31a   :  { %4113 = vtanh.f32 %v3899_v51 }
 0x31b   :  { %4115 = vtanh.f32 %v3900_v63  ;;  %v3607_v4 = vpop.f32.mrb[12].mxu1  ;;  %v2760_v63 = vsel %vm2602_vm7, 1.0, %v4149_v38  ;;  %vm2605_vm10 = vcmp.eq.s32.totalorder %v2587_v26, %v5265_v44 }
 0x31c   :  { %v4106_v1 = vpop.eup %4105  ;;  %v3901_v20 = vadd.f32 %v3607_v4, %v5223_v57  ;;  %v2537_v53 = vpop.f32.mrb[13].mxu1 }
 0x31d   :  { %v4108_v40 = vpop.eup %4107  ;;  %v3902_v14 = vadd.f32 %v5223_v57, %v2537_v53  ;;  %v2657_v19 = vmul.f32 %v4106_v1, %v5234_v0  ;;  %v2588_v1 = vadd.s32 80, %v5262_v54 }
 0x31e   :  { %4117 = vtanh.f32 %v3901_v20  ;;  %v2656_v31 = vmul.f32 %v4108_v40, %v5234_v0  ;;  %v2761_v20 = vsel %vm2603_vm8, 1.0, %v4149_v38 }
 0x31f   :  { %4119 = vtanh.f32 %v3902_v14  ;;  %2680 = vadd.xlane.f32.xlu1 %v2657_v19  ;;  %v3610_v24 = vpop.f32.mrb[14].mxu1  ;;  %v2589_v19 = vadd.s32 88, %v5262_v54  ;;  %vm2606_vm11 = vcmp.eq.s32.totalorder %v2588_v1, %v5265_v44 }
 0x320   :  { %v4110_v37 = vpop.eup %4109  ;;  %v3903_v5 = vadd.f32 %v3610_v24, %v5223_v57  ;;  %v2549_v61 = vpop.f32.mrb[15].mxu1  ;;  %2678 = vadd.xlane.f32.xlu0 %v2656_v31  ;;  %v2762_v31 = vsel %vm2604_vm9, 1.0, %v4149_v38 }
 0x321   :  { %v4112_v33 = vpop.eup %4111  ;;  %v3904_v2 = vadd.f32 %v5223_v57, %v2549_v61  ;;  %v2659_v52 = vmul.f32 %v4110_v37, %v5234_v0  ;;  %v2590_v61 = vadd.s32 96, %v5262_v54  ;;  %vm2607_vm12 = vcmp.eq.s32.totalorder %v2589_v19, %v5265_v44 }
 0x322   :  { %4121 = vtanh.f32 %v3903_v5  ;;  %v2658_v21 = vmul.f32 %v4112_v33, %v5234_v0  ;;  %v2763_v33 = vsel %vm2605_vm10, 1.0, %v4149_v38 }
 0x323   :  { %4123 = vtanh.f32 %v3904_v2  ;;  %2684 = vadd.xlane.f32.xlu1 %v2659_v52  ;;  %vm2608_vm13 = vcmp.eq.s32.totalorder %v2590_v61, %v5265_v44 }
 0x324   :  { %v4114_v6 = vpop.eup %4113  ;;  %2682 = vadd.xlane.f32.xlu0 %v2658_v21 }
 0x325   :  { %v4116_v9 = vpop.eup %4115  ;;  %v2661_v27 = vmul.f32 %v4114_v6, %v5234_v0  ;;  %v2591_v6 = vadd.s32 104, %v5262_v54 }
 0x326   :  { %v2660_v39 = vmul.f32 %v4116_v9, %v5234_v0  ;;  %v2764_v9 = vsel %vm2606_vm11, 1.0, %v4149_v38 }
 0x327   :  { %2688 = vadd.xlane.f32.xlu1 %v2661_v27  ;;  %vm2609_vm14 = vcmp.eq.s32.totalorder %v2591_v6, %v5265_v44 }
 0x328   :  { %v4118_v8 = vpop.eup %4117  ;;  %2686 = vadd.xlane.f32.xlu0 %v2660_v39  ;;  %v2767_v59 = vsel %vm2609_vm14, 1.0, %v4149_v38 }
 0x329   :  { %v4120_v41 = vpop.eup %4119  ;;  %v2663_v57 = vmul.f32 %v4118_v8, %v5234_v0 }
 0x32a   :  { %v2662_v45 = vmul.f32 %v4120_v41, %v5234_v0  ;;  %v2592_v41 = vadd.s32 112, %v5262_v54 }
 0x32b   :  { %2692 = vadd.xlane.f32.xlu1 %v2663_v57  ;;  %v2765_v57 = vsel %vm2607_vm12, 1.0, %v4149_v38 }
 0x32c   :  { %v4122_v56 = vpop.eup %4121  ;;  %2690 = vadd.xlane.f32.xlu0 %v2662_v45  ;;  %vm2610_vm15 = vcmp.eq.s32.totalorder %v2592_v41, %v5265_v44 }
 0x32d   :  { %v4124_v23 = vpop.eup %4123  ;;  %v2665_v10 = vmul.f32 %v4122_v56, %v5234_v0 }
 0x32e   :  { %v2664_v29 = vmul.f32 %v4124_v23, %v5234_v0 }
 0x32f   :  { %2696 = vadd.xlane.f32.xlu1 %v2665_v10  ;;  %v2593_v10 = vadd.s32 120, %v5262_v54 }
 0x330   :  { %2694 = vadd.xlane.f32.xlu0 %v2664_v29  ;;  %v2766_v29 = vsel %vm2608_vm13, 1.0, %v4149_v38 }
 0x331   :  { %vm2611_vm0 = vcmp.eq.s32.totalorder %v2593_v10, %v5265_v44  ;;  %v2735_v44 = vstv %s5335_s6 }
 0x332   :  { %v2769_v54 = vsel %vm2611_vm0, 1.0, %v4149_v38 }
 0x38f   :  { %v2667_v47 = vpop.xlane.xlu0 %2666 }
 0x390   :  { %v2698_v12 = vmul.f32 %v2754_v13, %v2667_v47  ;;  %v2768_v13 = vsel %vm2610_vm15, 1.0, %v4149_v38 }
 0x393   :  { %v2669_v49 = vpop.xlane.xlu0 %2668  ;;  %v2671_v0 = vpop.xlane.xlu1 %2670 }
 0x394   :  { %v2699_v62 = vmul.f32 %v2755_v35, %v2669_v49  ;;  %v2700_v46 = vmul.f32 %v2756_v55, %v2671_v0 }
 0x396   :  { %v2714_v18 = vadd.f32 %v2699_v62, %v2698_v12 }
 0x397   :  { %v2673_v32 = vpop.xlane.xlu1 %2672  ;;  %v2675_v60 = vpop.xlane.xlu0 %2674 }
 0x398   :  { %v2715_v11 = vadd.f32 %v2714_v18, %v2700_v46  ;;  %v2701_v48 = vmul.f32 %v2757_v7, %v2673_v32  ;;  %v2702_v25 = vmul.f32 %v2758_v42, %v2675_v60 }
 0x39a   :  { %v2716_v30 = vadd.f32 %v2715_v11, %v2701_v48 }
 0x39b   :  { %v2677_v50 = vpop.xlane.xlu1 %2676 }
 0x39c   :  { %v2717_v58 = vadd.f32 %v2716_v30, %v2702_v25  ;;  %v2703_v51 = vmul.f32 %v2759_v43, %v2677_v50 }
 0x39e   :  { %v2718_v40 = vadd.f32 %v2717_v58, %v2703_v51 }
 0x3ac   :  { %v2681_v4 = vpop.xlane.xlu1 %2680 }
 0x3ad   :  { %v2679_v53 = vpop.xlane.xlu0 %2678  ;;  %v2705_v24 = vmul.f32 %v2761_v20, %v2681_v4 }
 0x3ae   :  { %v2704_v14 = vmul.f32 %v2760_v63, %v2679_v53 }
 0x3b0   :  { %v2719_v37 = vadd.f32 %v2718_v40, %v2704_v14  ;;  %v2685_v5 = vpop.xlane.xlu1 %2684 }
 0x3b1   :  { %v2683_v2 = vpop.xlane.xlu0 %2682  ;;  %v2707_v27 = vmul.f32 %v2763_v33, %v2685_v5 }
 0x3b2   :  { %v2720_v52 = vadd.f32 %v2719_v37, %v2705_v24  ;;  %v2706_v21 = vmul.f32 %v2762_v31, %v2683_v2 }
 0x3b4   :  { %v2721_v39 = vadd.f32 %v2720_v52, %v2706_v21  ;;  %v2689_v8 = vpop.xlane.xlu1 %2688 }
 0x3b5   :  { %v2687_v45 = vpop.xlane.xlu0 %2686  ;;  %v2709_v3 = vmul.f32 %v2765_v57, %v2689_v8 }
 0x3b6   :  { %v2722_v56 = vadd.f32 %v2721_v39, %v2707_v27  ;;  %v2708_v23 = vmul.f32 %v2764_v9, %v2687_v45 }
 0x3b8   :  { %v2723_v15 = vadd.f32 %v2722_v56, %v2708_v23  ;;  %v2693_v47 = vpop.xlane.xlu1 %2692 }
 0x3b9   :  { %v2691_v35 = vpop.xlane.xlu0 %2690  ;;  %v2711_v0 = vmul.f32 %v2767_v59, %v2693_v47 }
 0x3ba   :  { %v2724_v49 = vadd.f32 %v2723_v15, %v2709_v3  ;;  %v2710_v28 = vmul.f32 %v2766_v29, %v2691_v35 }
 0x3bc   :  { %v2725_v62 = vadd.f32 %v2724_v49, %v2710_v28  ;;  %v2697_v12 = vpop.xlane.xlu1 %2696 }
 0x3bd   :  { %v2695_v55 = vpop.xlane.xlu0 %2694  ;;  %v2713_v7 = vmul.f32 %v2769_v54, %v2697_v12 }
 0x3be   :  { %v2726_v18 = vadd.f32 %v2725_v62, %v2711_v0  ;;  %v2712_v36 = vmul.f32 %v2768_v13, %v2695_v55 }
 0x3c0   :  { %v2727_v32 = vadd.f32 %v2726_v18, %v2712_v36 }
 0x3c2   :  { %v2728_v46 = vadd.f32 %v2727_v32, %v2713_v7 }
 0x3c4   :  { %v2729_v16 = vrot.slane %v2728_v46, 4 }
 0x3c6   :  { %v2730_v11 = vadd.f32 %v2729_v16, %v2728_v46 }
 0x3c8   :  { %v2731_v48 = vrot.slane %v2730_v11, 2 }
 0x3ca   :  { %v2732_v22 = vadd.f32 %v2731_v48, %v2730_v11 }
 0x3cc   :  { %v2733_v42 = vrot.slane %v2732_v22, 1 }
 0x3ce   :  { %v2734_v60 = vadd.f32 %v2733_v42, %v2732_v22 }
 0x3d0   :  { %v2736_v38 = vadd.f32 %v2735_v44, %v2734_v60 }
 0x3d2   :  { %2737 = vst [vmem:[#allocation3] sm:$0x1] %v2736_v38 }
 0x3d3   :  { %4136 = shalt.err (!%p4133_p4)
}
 0x3d4   :  { %s4137_s9 = scalar_lea.hbm %s5336_s7, 16 }
 0x3d5   :  { %p4138_p5 = scmp.ne.s32.totalorder %s5336_s7, %s4137_s9  ;;  %p4141_p6 = scmp.lt.u32.totalorder %s4137_s9, %s5336_s7 }
 0x3d7   :  { %p4143_p7 = pnand %p4141_p6, %p4138_p5 }
 0x3d9   :  { %4146 = shalt.err (!%p4143_p7)
}
 0x3da   :  { %2747 = dma.vmem_to_hbm [thread:$0]  %s2745_s27, 16, %s5336_s7, [#allocation4]  }
 0x3db   :  { %4147 = dma.done.wait [#allocation4], 16  }
 0x3dc   :  { %4148 = vsyncadd [#allocation4], 4294967280 }
 0x3dd   :  { %2751 = vsyncpa [#allocation4], 1 }

</bundles_post_ra>
